<compile_context>
chip_gen: v5e
topology: v5e:2x2
jax: 0.10.0
libtpu: 0.0.40
codegen_flags: <defaults>
</compile_context>

<pallas_src>
import jax
import jax.numpy as jnp
from jax.experimental import pallas as pl
from jax.experimental.pallas import tpu as pltpu

OUT_CHANNELS = 200
C_PAD = 256            # 200 padded up to a lane-dense multiple of 128
C_TOT = 3 * C_PAD      # three ChebConv outputs packed into one buffer


def _round_up(v, m):
    return (v + m - 1) // m * m


# ---------------------------------------------------------------------------
# Pass 1: T1 = L_hat @ x   (rows "parallel" x L_hat-column reduction)
# ---------------------------------------------------------------------------
def t1_kernel(lhat_ref, x_ref, t1_ref, acc_ref):
    k = pl.program_id(1)

    @pl.when(k == 0)
    def _():
        acc_ref[...] = jnp.zeros_like(acc_ref)

    acc_ref[...] += jnp.dot(lhat_ref[...], x_ref[...],
                            preferred_element_type=jnp.float32)

    @pl.when(k == pl.num_programs(1) - 1)
    def _():
        t1_ref[...] = acc_ref[...].astype(t1_ref.dtype)


# ---------------------------------------------------------------------------
# Pass 2: U = L_hat @ T1 ; T2 = 2U - T0 ; consolidated projections + biases
# ---------------------------------------------------------------------------
def chev_kernel(lhat_ref, t1k_ref, x_ref, t1i_ref,
                w0_ref, w1_ref, w2_ref, b_ref, out_ref, acc_ref):
    k = pl.program_id(1)

    @pl.when(k == 0)
    def _():
        acc_ref[...] = jnp.zeros_like(acc_ref)

    acc_ref[...] += jnp.dot(lhat_ref[...], t1k_ref[...],
                            preferred_element_type=jnp.float32)

    @pl.when(k == pl.num_programs(1) - 1)
    def _():
        t0 = x_ref[...]                             # f32 (tm, F)
        t1 = t1i_ref[...].astype(jnp.float32)       # (tm, F)
        t2 = 2.0 * acc_ref[...] - t0                # (tm, F)
        out_ref[...] = (
            jnp.dot(t0, w0_ref[...], preferred_element_type=jnp.float32)
            + jnp.dot(t1, w1_ref[...], preferred_element_type=jnp.float32)
            + jnp.dot(t2, w2_ref[...], preferred_element_type=jnp.float32)
            + b_ref[...])


# ---------------------------------------------------------------------------
# Graph normalization (plain-JAX glue) and parameter packing
# ---------------------------------------------------------------------------
def build_scaled_laplacian(edge_index, edge_weight, num_nodes):
    """Dense L_hat = -D^{-1/2} A D^{-1/2} (sym norm, lambda_max=2.0)."""
    # TODO(synk): the edge-list scatter / degree normalization stays in plain
    # JAX; a dynamic scatter from edge lists has no clean Pallas-TPU form here.
    row, col = edge_index[0], edge_index[1]
    w = edge_weight.astype(jnp.float32)
    adj = jnp.zeros((num_nodes, num_nodes), jnp.float32).at[row, col].add(w)
    deg = jnp.zeros((num_nodes,), jnp.float32).at[row].add(w)
    dinv_sqrt = jnp.where(deg > 0, 1.0 / jnp.sqrt(deg), 0.0)
    return -(dinv_sqrt[:, None] * adj * dinv_sqrt[None, :])


def _pack_params(params):
    """Zero-pad 200->256 and concatenate weights sharing the same LHS."""
    pc = lambda w: jnp.pad(w, ((0, 0), (0, C_PAD - OUT_CHANNELS)))
    f = params["w1_0"].shape[0]
    z = jnp.zeros((f, C_PAD), jnp.float32)
    w0c = jnp.concatenate(
        [pc(params["w1_0"]), pc(params["w2_0"]), pc(params["w3_0"])], axis=1)
    w1c = jnp.concatenate([z, pc(params["w2_1"]), pc(params["w3_1"])], axis=1)
    w2c = jnp.concatenate([z, z, pc(params["w3_2"])], axis=1)
    bc = jnp.concatenate(
        [pc(params["b1"]), pc(params["b2"]), pc(params["b3"])], axis=1)
    return w0c, w1c, w2c, bc


def glorot(key, fan_in, fan_out):
    limit = jnp.sqrt(6.0 / (fan_in + fan_out))
    return jax.random.uniform(key, (fan_in, fan_out), jnp.float32, -limit, limit)


def init_params(key, in_channels, out_channels=OUT_CHANNELS):
    ks = jax.random.split(key, 6)
    return {
        "w1_0": glorot(ks[0], in_channels, out_channels),
        "b1": jnp.zeros((1, out_channels), jnp.float32),
        "w2_0": glorot(ks[1], in_channels, out_channels),
        "w2_1": glorot(ks[2], in_channels, out_channels),
        "b2": jnp.zeros((1, out_channels), jnp.float32),
        "w3_0": glorot(ks[3], in_channels, out_channels),
        "w3_1": glorot(ks[4], in_channels, out_channels),
        "w3_2": glorot(ks[5], in_channels, out_channels),
        "b3": jnp.zeros((1, out_channels), jnp.float32),
    }


# ---------------------------------------------------------------------------
# Forward
# ---------------------------------------------------------------------------
@jax.jit
def multichev_forward(x, edge_index, edge_weight, params):
    n, f = x.shape
    lhat = build_scaled_laplacian(edge_index, edge_weight, n)

    block = min(512, _round_up(n, 128))     # 128-aligned row/col tiles
    n_pad = _round_up(n, block)
    grid = (n_pad // block, n_pad // block)

    x_f32 = jnp.pad(x.astype(jnp.float32), ((0, n_pad - n), (0, 0)))
    x_bf16 = x_f32.astype(jnp.bfloat16)
    lhat_bf16 = jnp.pad(lhat, ((0, n_pad - n), (0, n_pad - n))).astype(jnp.bfloat16)

    w0c, w1c, w2c, bc = _pack_params(params)

    cparams = pltpu.CompilerParams(
        dimension_semantics=("parallel", "arbitrary"),
        vmem_limit_bytes=64 * 1024 * 1024)

    # ---- Pass 1: T1 = L_hat @ x -------------------------------------------
    t1_bf16 = pl.pallas_call(
        t1_kernel,
        out_shape=jax.ShapeDtypeStruct((n_pad, f), jnp.bfloat16),
        grid_spec=pltpu.PrefetchScalarGridSpec(
            num_scalar_prefetch=0,
            grid=grid,
            in_specs=[pl.BlockSpec((block, block), lambda i, k: (i, k)),
                      pl.BlockSpec((block, f), lambda i, k: (k, 0))],
            out_specs=pl.BlockSpec((block, f), lambda i, k: (i, 0)),
            scratch_shapes=[pltpu.VMEM((block, f), jnp.float32)]),
        compiler_params=cparams,
    )(lhat_bf16, x_bf16)

    # ---- Pass 2: T2 + consolidated projections, one lane-dense output ------
    packed = pl.pallas_call(
        chev_kernel,
        out_shape=jax.ShapeDtypeStruct((n_pad, C_TOT), jnp.float32),
        grid_spec=pltpu.PrefetchScalarGridSpec(
            num_scalar_prefetch=0,
            grid=grid,
            in_specs=[pl.BlockSpec((block, block), lambda i, k: (i, k)),  # L_hat
                      pl.BlockSpec((block, f), lambda i, k: (k, 0)),      # T1 (reduction)
                      pl.BlockSpec((block, f), lambda i, k: (i, 0)),      # T0 row block (f32)
                      pl.BlockSpec((block, f), lambda i, k: (i, 0)),      # T1 row block
                      pl.BlockSpec((f, C_TOT), lambda i, k: (0, 0)),      # [W1_0|W2_0|W3_0]
                      pl.BlockSpec((f, C_TOT), lambda i, k: (0, 0)),      # [0|W2_1|W3_1]
                      pl.BlockSpec((f, C_TOT), lambda i, k: (0, 0)),      # [0|0|W3_2]
                      pl.BlockSpec((1, C_TOT), lambda i, k: (0, 0))],     # [b1|b2|b3]
            out_specs=pl.BlockSpec((block, C_TOT), lambda i, k: (i, 0)),
            scratch_shapes=[pltpu.VMEM((block, f), jnp.float32)]),
        compiler_params=cparams,
    )(lhat_bf16, t1_bf16, x_f32, t1_bf16, w0c, w1c, w2c, bc)

    s1 = packed[:n, 0:OUT_CHANNELS]
    s2 = packed[:n, C_PAD:C_PAD + OUT_CHANNELS]
    s3 = packed[:n, 2 * C_PAD:2 * C_PAD + OUT_CHANNELS]
    return s1, s2, s3


def _reference(x, edge_index, edge_weight, params):
    lhat = build_scaled_laplacian(edge_index, edge_weight, x.shape[0])
    t0 = x
    t1 = lhat @ t0
    t2 = 2.0 * (lhat @ t1) - t0
    s1 = t0 @ params["w1_0"] + params["b1"]
    s2 = t0 @ params["w2_0"] + t1 @ params["w2_1"] + params["b2"]
    s3 = (t0 @ params["w3_0"] + t1 @ params["w3_1"] + t2 @ params["w3_2"]
          + params["b3"])
    return s1, s2, s3


if __name__ == "__main__":
    key = jax.random.PRNGKey(0)
    k_x, k_w, k_ew = jax.random.split(key, 3)

    num_nodes = 16
    in_channels = 8

    # Node features.
    x = jax.random.normal(k_x, (num_nodes, in_channels), jnp.float32)

    # Small ring graph, bidirectional edges with positive weights.
    src = jnp.arange(num_nodes, dtype=jnp.int32)
    dst = (src + 1) % num_nodes
    edge_index = jnp.concatenate(
        [jnp.stack([src, dst]), jnp.stack([dst, src])], axis=1)   # [2, 2N]
    edge_weight = jax.random.uniform(
        k_ew, (edge_index.shape[1],), jnp.float32, 0.5, 1.5)

    params = init_params(k_w, in_channels)

    s1, s2, s3 = multichev_forward(x, edge_index, edge_weight, params)
    jax.block_until_ready((s1, s2, s3))

    # Sanity check against plain-JAX f32 reference.
    r1, r2, r3 = _reference(x, edge_index, edge_weight, params)
    assert s1.shape == (num_nodes, OUT_CHANNELS)
    assert s2.shape == (num_nodes, OUT_CHANNELS)
    assert s3.shape == (num_nodes, OUT_CHANNELS)
    # scale_1 uses only the f32 T0 path -> tight tolerance.
    assert jnp.allclose(s1, r1, atol=1e-3, rtol=1e-3), "scale_1 mismatch"
    # scale_2 / scale_3 stream L_hat / x / T1 through the MXU as bf16
    # (f32 accumulation), so allow bf16-level tolerance.
    assert jnp.allclose(s2, r2, atol=5e-2, rtol=5e-2), "scale_2 mismatch"
    assert jnp.allclose(s3, r3, atol=5e-2, rtol=5e-2), "scale_3 mismatch"

    print("KERNEL_OK")
</pallas_src>

<mosaic_0001>
module attributes {stable_mosaic.version = 11 : i64} {
  func.func @t1_kernel(%arg0: i32, %arg1: i32, %arg2: memref<128x128xbf16, #tpu.memory_space<vmem>>, %arg3: memref<128x8xbf16, #tpu.memory_space<vmem>>, %arg4: memref<128x8xbf16, #tpu.memory_space<vmem>>, %arg5: memref<128x8xf32, #tpu.memory_space<vmem>>) attributes {dimension_semantics = [#tpu.dimension_semantics<parallel>, #tpu.dimension_semantics<arbitrary>], iteration_bounds = array<i64: 1, 1>, scalar_prefetch = 0 : i64, scratch_operands = 1 : i64, tpu.core_type = #tpu.core_type<tc>, window_params = [{transform_indices = @transform_0, window_bounds = array<i64: 128, 128>}, {transform_indices = @transform_1, window_bounds = array<i64: 128, 8>}, {transform_indices = @transform_2, window_bounds = array<i64: 128, 8>}]} {
    %c0_i32 = arith.constant 0 : i32
    %0 = arith.cmpi eq, %arg1, %c0_i32 : i32
    %1 = arith.extui %0 : i1 to i32
    %c0_i32_0 = arith.constant 0 : i32
    %2 = arith.cmpi ne, %1, %c0_i32_0 : i32
    scf.if %2 {
      %cst_10 = arith.constant 0.000000e+00 : f32
      %12 = vector.broadcast %cst_10 : f32 to vector<128x8xf32>
      %c0_11 = arith.constant 0 : index
      %c0_12 = arith.constant 0 : index
      %13 = vector.load %arg5[%c0_11, %c0_12] : memref<128x8xf32, #tpu.memory_space<vmem>>, vector<128x8xf32>
      tpu.vector_store %arg5[%c0_11, %c0_12], %12 {strides = array<i32>} : memref<128x8xf32, #tpu.memory_space<vmem>>, vector<128x8xf32>,
    } else {
    }
    %c0 = arith.constant 0 : index
    %c0_1 = arith.constant 0 : index
    %3 = vector.load %arg5[%c0, %c0_1] : memref<128x8xf32, #tpu.memory_space<vmem>>, vector<128x8xf32>
    %c0_2 = arith.constant 0 : index
    %c0_3 = arith.constant 0 : index
    %4 = vector.load %arg2[%c0_2, %c0_3] : memref<128x128xbf16, #tpu.memory_space<vmem>>, vector<128x128xbf16>
    %c0_4 = arith.constant 0 : index
    %c0_5 = arith.constant 0 : index
    %5 = vector.load %arg3[%c0_4, %c0_5] : memref<128x8xbf16, #tpu.memory_space<vmem>>, vector<128x8xbf16>
    %cst = arith.constant dense<0.000000e+00> : vector<128x8xf32>
    %6 = tpu.matmul %4, %5, %cst {dimension_numbers = #tpu.dot_dimension_numbers<[1], [0], [0], [1], [0, 0, 1, 1], [], []>} : vector<128x128xbf16>, vector<128x8xbf16>, vector<128x8xf32> -> vector<128x8xf32>
    %7 = arith.addf %3, %6 : vector<128x8xf32>
    %c0_6 = arith.constant 0 : index
    %c0_7 = arith.constant 0 : index
    %8 = vector.load %arg5[%c0_6, %c0_7] : memref<128x8xf32, #tpu.memory_space<vmem>>, vector<128x8xf32>
    tpu.vector_store %arg5[%c0_6, %c0_7], %7 {strides = array<i32>} : memref<128x8xf32, #tpu.memory_space<vmem>>, vector<128x8xf32>,
    %c0_i32_8 = arith.constant 0 : i32
    %9 = arith.cmpi eq, %arg1, %c0_i32_8 : i32
    %10 = arith.extui %9 : i1 to i32
    %c0_i32_9 = arith.constant 0 : i32
    %11 = arith.cmpi ne, %10, %c0_i32_9 : i32
    scf.if %11 {
      %c0_10 = arith.constant 0 : index
      %c0_11 = arith.constant 0 : index
      %12 = vector.load %arg5[%c0_10, %c0_11] : memref<128x8xf32, #tpu.memory_space<vmem>>, vector<128x8xf32>
      %13 = arith.truncf %12 : vector<128x8xf32> to vector<128x8xbf16>
      %c0_12 = arith.constant 0 : index
      %c0_13 = arith.constant 0 : index
      %14 = vector.load %arg4[%c0_12, %c0_13] : memref<128x8xbf16, #tpu.memory_space<vmem>>, vector<128x8xbf16>
      tpu.vector_store %arg4[%c0_12, %c0_13], %13 {strides = array<i32>} : memref<128x8xbf16, #tpu.memory_space<vmem>>, vector<128x8xbf16>,
    } else {
    }
    return
  }
  func.func @transform_0(%arg0: i32, %arg1: i32) -> (i32, i32) {
    %c0_i32 = arith.constant 0 : i32
    return %arg0, %arg1 : i32, i32
  }
  func.func @transform_1(%arg0: i32, %arg1: i32) -> (i32, i32) {
    %c0_i32 = arith.constant 0 : i32
    %c0_i32_0 = arith.constant 0 : i32
    return %arg1, %c0_i32 : i32, i32
  }
  func.func @transform_2(%arg0: i32, %arg1: i32) -> (i32, i32) {
    %c0_i32 = arith.constant 0 : i32
    %c0_i32_0 = arith.constant 0 : i32
    return %arg0, %c0_i32 : i32, i32
  }
}

module attributes {stable_mosaic.version = 11 : i64} {
  func.func @chev_kernel(%arg0: i32, %arg1: i32, %arg2: memref<128x128xbf16, #tpu.memory_space<vmem>>, %arg3: memref<128x8xbf16, #tpu.memory_space<vmem>>, %arg4: memref<128x8xf32, #tpu.memory_space<vmem>>, %arg5: memref<128x8xbf16, #tpu.memory_space<vmem>>, %arg6: memref<8x768xf32, #tpu.memory_space<vmem>>, %arg7: memref<8x768xf32, #tpu.memory_space<vmem>>, %arg8: memref<8x768xf32, #tpu.memory_space<vmem>>, %arg9: memref<1x768xf32, #tpu.memory_space<vmem>>, %arg10: memref<128x768xf32, #tpu.memory_space<vmem>>, %arg11: memref<128x8xf32, #tpu.memory_space<vmem>>) attributes {dimension_semantics = [#tpu.dimension_semantics<parallel>, #tpu.dimension_semantics<arbitrary>], iteration_bounds = array<i64: 1, 1>, scalar_prefetch = 0 : i64, scratch_operands = 1 : i64, tpu.core_type = #tpu.core_type<tc>, window_params = [{transform_indices = @transform_0, window_bounds = array<i64: 128, 128>}, {transform_indices = @transform_1, window_bounds = array<i64: 128, 8>}, {transform_indices = @transform_2, window_bounds = array<i64: 128, 8>}, {transform_indices = @transform_3, window_bounds = array<i64: 128, 8>}, {pipeline_mode = #tpu.pipeline_mode<synchronous>, transform_indices = @transform_4, window_bounds = array<i64: 8, 768>}, {pipeline_mode = #tpu.pipeline_mode<synchronous>, transform_indices = @transform_5, window_bounds = array<i64: 8, 768>}, {pipeline_mode = #tpu.pipeline_mode<synchronous>, transform_indices = @transform_6, window_bounds = array<i64: 8, 768>}, {pipeline_mode = #tpu.pipeline_mode<synchronous>, transform_indices = @transform_7, window_bounds = array<i64: 1, 768>}, {transform_indices = @transform_8, window_bounds = array<i64: 128, 768>}]} {
    %c0_i32 = arith.constant 0 : i32
    %0 = arith.cmpi eq, %arg1, %c0_i32 : i32
    %1 = arith.extui %0 : i1 to i32
    %c0_i32_0 = arith.constant 0 : i32
    %2 = arith.cmpi ne, %1, %c0_i32_0 : i32
    scf.if %2 {
      %cst_10 = arith.constant 0.000000e+00 : f32
      %12 = vector.broadcast %cst_10 : f32 to vector<128x8xf32>
      %c0_11 = arith.constant 0 : index
      %c0_12 = arith.constant 0 : index
      %13 = vector.load %arg11[%c0_11, %c0_12] : memref<128x8xf32, #tpu.memory_space<vmem>>, vector<128x8xf32>
      tpu.vector_store %arg11[%c0_11, %c0_12], %12 {strides = array<i32>} : memref<128x8xf32, #tpu.memory_space<vmem>>, vector<128x8xf32>,
    } else {
    }
    %c0 = arith.constant 0 : index
    %c0_1 = arith.constant 0 : index
    %3 = vector.load %arg11[%c0, %c0_1] : memref<128x8xf32, #tpu.memory_space<vmem>>, vector<128x8xf32>
    %c0_2 = arith.constant 0 : index
    %c0_3 = arith.constant 0 : index
    %4 = vector.load %arg2[%c0_2, %c0_3] : memref<128x128xbf16, #tpu.memory_space<vmem>>, vector<128x128xbf16>
    %c0_4 = arith.constant 0 : index
    %c0_5 = arith.constant 0 : index
    %5 = vector.load %arg3[%c0_4, %c0_5] : memref<128x8xbf16, #tpu.memory_space<vmem>>, vector<128x8xbf16>
    %cst = arith.constant dense<0.000000e+00> : vector<128x8xf32>
    %6 = tpu.matmul %4, %5, %cst {dimension_numbers = #tpu.dot_dimension_numbers<[1], [0], [0], [1], [0, 0, 1, 1], [], []>} : vector<128x128xbf16>, vector<128x8xbf16>, vector<128x8xf32> -> vector<128x8xf32>
    %7 = arith.addf %3, %6 : vector<128x8xf32>
    %c0_6 = arith.constant 0 : index
    %c0_7 = arith.constant 0 : index
    %8 = vector.load %arg11[%c0_6, %c0_7] : memref<128x8xf32, #tpu.memory_space<vmem>>, vector<128x8xf32>
    tpu.vector_store %arg11[%c0_6, %c0_7], %7 {strides = array<i32>} : memref<128x8xf32, #tpu.memory_space<vmem>>, vector<128x8xf32>,
    %c0_i32_8 = arith.constant 0 : i32
    %9 = arith.cmpi eq, %arg1, %c0_i32_8 : i32
    %10 = arith.extui %9 : i1 to i32
    %c0_i32_9 = arith.constant 0 : i32
    %11 = arith.cmpi ne, %10, %c0_i32_9 : i32
    scf.if %11 {
      %c0_10 = arith.constant 0 : index
      %c0_11 = arith.constant 0 : index
      %12 = vector.load %arg4[%c0_10, %c0_11] : memref<128x8xf32, #tpu.memory_space<vmem>>, vector<128x8xf32>
      %c0_12 = arith.constant 0 : index
      %c0_13 = arith.constant 0 : index
      %13 = vector.load %arg5[%c0_12, %c0_13] : memref<128x8xbf16, #tpu.memory_space<vmem>>, vector<128x8xbf16>
      %14 = arith.extf %13 : vector<128x8xbf16> to vector<128x8xf32>
      %c0_14 = arith.constant 0 : index
      %c0_15 = arith.constant 0 : index
      %15 = vector.load %arg11[%c0_14, %c0_15] : memref<128x8xf32, #tpu.memory_space<vmem>>, vector<128x8xf32>
      %cst_16 = arith.constant 2.000000e+00 : f32
      %16 = vector.broadcast %cst_16 : f32 to vector<128x8xf32>
      %17 = arith.mulf %16, %15 : vector<128x8xf32>
      %18 = arith.subf %17, %12 : vector<128x8xf32>
      %c0_17 = arith.constant 0 : index
      %c0_18 = arith.constant 0 : index
      %19 = vector.load %arg6[%c0_17, %c0_18] : memref<8x768xf32, #tpu.memory_space<vmem>>, vector<8x768xf32>
      %cst_19 = arith.constant dense<0.000000e+00> : vector<128x768xf32>
      %20 = tpu.matmul %12, %19, %cst_19 {dimension_numbers = #tpu.dot_dimension_numbers<[1], [0], [0], [1], [0, 0, 1, 1], [], []>} : vector<128x8xf32>, vector<8x768xf32>, vector<128x768xf32> -> vector<128x768xf32>
      %c0_20 = arith.constant 0 : index
      %c0_21 = arith.constant 0 : index
      %21 = vector.load %arg7[%c0_20, %c0_21] : memref<8x768xf32, #tpu.memory_space<vmem>>, vector<8x768xf32>
      %cst_22 = arith.constant dense<0.000000e+00> : vector<128x768xf32>
      %22 = tpu.matmul %14, %21, %cst_22 {dimension_numbers = #tpu.dot_dimension_numbers<[1], [0], [0], [1], [0, 0, 1, 1], [], []>} : vector<128x8xf32>, vector<8x768xf32>, vector<128x768xf32> -> vector<128x768xf32>
      %23 = arith.addf %20, %22 : vector<128x768xf32>
      %c0_23 = arith.constant 0 : index
      %c0_24 = arith.constant 0 : index
      %24 = vector.load %arg8[%c0_23, %c0_24] : memref<8x768xf32, #tpu.memory_space<vmem>>, vector<8x768xf32>
      %cst_25 = arith.constant dense<0.000000e+00> : vector<128x768xf32>
      %25 = tpu.matmul %18, %24, %cst_25 {dimension_numbers = #tpu.dot_dimension_numbers<[1], [0], [0], [1], [0, 0, 1, 1], [], []>} : vector<128x8xf32>, vector<8x768xf32>, vector<128x768xf32> -> vector<128x768xf32>
      %26 = arith.addf %23, %25 : vector<128x768xf32>
      %c0_26 = arith.constant 0 : index
      %c0_27 = arith.constant 0 : index
      %27 = vector.load %arg9[%c0_26, %c0_27] : memref<1x768xf32, #tpu.memory_space<vmem>>, vector<1x768xf32>
      %28 = vector.broadcast %27 : vector<1x768xf32> to vector<128x768xf32>
      %29 = arith.addf %26, %28 : vector<128x768xf32>
      %c0_28 = arith.constant 0 : index
      %c0_29 = arith.constant 0 : index
      %30 = vector.load %arg10[%c0_28, %c0_29] : memref<128x768xf32, #tpu.memory_space<vmem>>, vector<128x768xf32>
      tpu.vector_store %arg10[%c0_28, %c0_29], %29 {strides = array<i32>} : memref<128x768xf32, #tpu.memory_space<vmem>>, vector<128x768xf32>,
    } else {
    }
    return
  }
  func.func @transform_0(%arg0: i32, %arg1: i32) -> (i32, i32) {
    %c0_i32 = arith.constant 0 : i32
    return %arg0, %arg1 : i32, i32
  }
  func.func @transform_1(%arg0: i32, %arg1: i32) -> (i32, i32) {
    %c0_i32 = arith.constant 0 : i32
    %c0_i32_0 = arith.constant 0 : i32
    return %arg1, %c0_i32 : i32, i32
  }
  func.func @transform_2(%arg0: i32, %arg1: i32) -> (i32, i32) {
    %c0_i32 = arith.constant 0 : i32
    %c0_i32_0 = arith.constant 0 : i32
    return %arg0, %c0_i32 : i32, i32
  }
  func.func @transform_3(%arg0: i32, %arg1: i32) -> (i32, i32) {
    %c0_i32 = arith.constant 0 : i32
    %c0_i32_0 = arith.constant 0 : i32
    return %arg0, %c0_i32 : i32, i32
  }
  func.func @transform_4(%arg0: i32, %arg1: i32) -> (i32, i32) {
    %c0_i32 = arith.constant 0 : i32
    %c0_i32_0 = arith.constant 0 : i32
    %c0_i32_1 = arith.constant 0 : i32
    return %c0_i32, %c0_i32_0 : i32, i32
  }
  func.func @transform_5(%arg0: i32, %arg1: i32) -> (i32, i32) {
    %c0_i32 = arith.constant 0 : i32
    %c0_i32_0 = arith.constant 0 : i32
    %c0_i32_1 = arith.constant 0 : i32
    return %c0_i32, %c0_i32_0 : i32, i32
  }
  func.func @transform_6(%arg0: i32, %arg1: i32) -> (i32, i32) {
    %c0_i32 = arith.constant 0 : i32
    %c0_i32_0 = arith.constant 0 : i32
    %c0_i32_1 = arith.constant 0 : i32
    return %c0_i32, %c0_i32_0 : i32, i32
  }
  func.func @transform_7(%arg0: i32, %arg1: i32) -> (i32, i32) {
    %c0_i32 = arith.constant 0 : i32
    %c0_i32_0 = arith.constant 0 : i32
    %c0_i32_1 = arith.constant 0 : i32
    return %c0_i32, %c0_i32_0 : i32, i32
  }
  func.func @transform_8(%arg0: i32, %arg1: i32) -> (i32, i32) {
    %c0_i32 = arith.constant 0 : i32
    %c0_i32_0 = arith.constant 0 : i32
    return %arg0, %c0_i32 : i32, i32
  }
}

</mosaic_0001>

<bundles_post_ra>
// kernel: multichev_forward.2
= control target key start
LH: loop header
LB: loop body
LE: loop exit
PB: predicated region body
PF: predicated region fallthrough
CT: control target
= control target key end

     0   :  { %vm15_vm0 = vcmask 64512   ;;  %v419_v6 = vmov 0.0   ;;  %vm293_vm1 = vcmask 60416   ;;  %s579_s1 = inlined_call_operand.vmem [shape: bf16[128,8], index: 1, kind: input, shape index: {}]   ;;  %s580_s0 = inlined_call_operand.vmem [shape: bf16[128,128], index: 0, kind: input, shape index: {}]   ;;  %s581_s2 = inlined_call_operand.vmem [shape: bf16[128,8], index: 2, kind: output, shape index: {}]  }
   0x1   :  { %v393_v0 = vld [vmem:[%s579_s1 + $0x38] sm:$0xff]  ;;  %v392_v1 = vld [vmem:[%s579_s1 + $0x30] sm:$0xff]  ;;  %v391_v2 = vld [vmem:[%s579_s1 + $0x28] sm:$0xff]  ;;  %16 = vst.msk [vmem:[#allocation2] sm:$0xff] %vm15_vm0, %v419_v6 }
   0x2   :  { %176 = vmatpush.bf16.msra.mxu0 %v393_v0  ;;  %394 = vmatpush.bf16.msra.mxu1 %v393_v0  ;;  %v390_v3 = vld [vmem:[%s579_s1 + $0x20] sm:$0xff]  ;;  %v389_v4 = vld [vmem:[%s579_s1 + $0x18] sm:$0xff]  ;;  %v388_v5 = vld [vmem:[%s579_s1 + $0x10] sm:$0xff]  ;;  %17 = vst.msk [vmem:[#allocation2 + $0x8] sm:$0xff] %vm15_vm0, %v419_v6 }
   0x3   :  { %395 = vmatpush.bf16.msra.mxu2 %v393_v0  ;;  %396 = vmatpush.bf16.msra.mxu3 %v393_v0  ;;  %18 = vst.msk [vmem:[#allocation2 + $0x10] sm:$0xff] %vm15_vm0, %v419_v6  ;;  %v387_v7 = vld [vmem:[%s579_s1 + $0x8] sm:$0xff]  ;;  %v386_v8 = vld [vmem:[%s579_s1] sm:$0xff]  ;;  %v380_v10 = vld [vmem:[%s580_s0 + $0x10] sm:$0xff] }
   0x4   :  { %19 = vst.msk [vmem:[#allocation2 + $0x18] sm:$0xff] %vm15_vm0, %v419_v6  ;;  %v378_v9 = vld [vmem:[%s580_s0] sm:$0xff]  ;;  %v384_v12 = vld [vmem:[%s580_s0 + $0x30] sm:$0xff]  ;;  %v379_v13 = vld [vmem:[%s580_s0 + $0x8] sm:$0xff] }
   0x5   :  { %20 = vst.msk [vmem:[#allocation2 + $0x20] sm:$0xff] %vm15_vm0, %v419_v6  ;;  %v382_v11 = vld [vmem:[%s580_s0 + $0x20] sm:$0xff]  ;;  %v381_v14 = vld [vmem:[%s580_s0 + $0x18] sm:$0xff]  ;;  %v383_v15 = vld [vmem:[%s580_s0 + $0x28] sm:$0xff] }
   0x6   :  { %177 = vmatpush.bf16.msra.mxu0 %v392_v1  ;;  %397 = vmatpush.bf16.msra.mxu1 %v392_v1  ;;  %21 = vst.msk [vmem:[#allocation2 + $0x28] sm:$0xff] %vm15_vm0, %v419_v6  ;;  %v385_v16 = vld [vmem:[%s580_s0 + $0x38] sm:$0xff] }
   0x7   :  { %398 = vmatpush.bf16.msra.mxu2 %v392_v1  ;;  %399 = vmatpush.bf16.msra.mxu3 %v392_v1  ;;  %22 = vst.msk [vmem:[#allocation2 + $0x30] sm:$0xff] %vm15_vm0, %v419_v6 }
   0x8   :  { %23 = vst.msk [vmem:[#allocation2 + $0x38] sm:$0xff] %vm15_vm0, %v419_v6  ;;  %v32_v17 = vld [vmem:[#allocation2] sm:$0xff] }
   0x9   :  { %24 = vst.msk [vmem:[#allocation2 + $0x40] sm:$0xff] %vm15_vm0, %v419_v6  ;;  %v33_v25 = vld [vmem:[#allocation2 + $0x8] sm:$0xff] }
   0xa   :  { %178 = vmatpush.bf16.msra.mxu0 %v391_v2  ;;  %400 = vmatpush.bf16.msra.mxu1 %v391_v2  ;;  %25 = vst.msk [vmem:[#allocation2 + $0x48] sm:$0xff] %vm15_vm0, %v419_v6  ;;  %v34_v45 = vld [vmem:[#allocation2 + $0x10] sm:$0xff] }
   0xb   :  { %401 = vmatpush.bf16.msra.mxu2 %v391_v2  ;;  %402 = vmatpush.bf16.msra.mxu3 %v391_v2  ;;  %26 = vst.msk [vmem:[#allocation2 + $0x50] sm:$0xff] %vm15_vm0, %v419_v6  ;;  %v35_v63 = vld [vmem:[#allocation2 + $0x18] sm:$0xff] }
   0xc   :  { %27 = vst.msk [vmem:[#allocation2 + $0x58] sm:$0xff] %vm15_vm0, %v419_v6  ;;  %v36_v18 = vld [vmem:[#allocation2 + $0x20] sm:$0xff] }
   0xd   :  { %28 = vst.msk [vmem:[#allocation2 + $0x60] sm:$0xff] %vm15_vm0, %v419_v6  ;;  %v37_v31 = vld [vmem:[#allocation2 + $0x28] sm:$0xff] }
   0xe   :  { %179 = vmatpush.bf16.msra.mxu0 %v390_v3  ;;  %403 = vmatpush.bf16.msra.mxu1 %v390_v3  ;;  %29 = vst.msk [vmem:[#allocation2 + $0x68] sm:$0xff] %vm15_vm0, %v419_v6  ;;  %v38_v49 = vld [vmem:[#allocation2 + $0x30] sm:$0xff] }
   0xf   :  { %404 = vmatpush.bf16.msra.mxu2 %v390_v3  ;;  %405 = vmatpush.bf16.msra.mxu3 %v390_v3  ;;  %30 = vst.msk [vmem:[#allocation2 + $0x70] sm:$0xff] %vm15_vm0, %v419_v6  ;;  %v39_v3 = vld [vmem:[#allocation2 + $0x38] sm:$0xff] }
  0x10   :  { %31 = vst.msk [vmem:[#allocation2 + $0x78] sm:$0xff] %vm15_vm0, %v419_v6  ;;  %v40_v23 = vld [vmem:[#allocation2 + $0x40] sm:$0xff] }
  0x11   :  { %v41_v39 = vld [vmem:[#allocation2 + $0x48] sm:$0xff] }
  0x12   :  { %180 = vmatpush.bf16.msra.mxu0 %v389_v4  ;;  %406 = vmatpush.bf16.msra.mxu1 %v389_v4  ;;  %v42_v57 = vld [vmem:[#allocation2 + $0x50] sm:$0xff] }
  0x13   :  { %407 = vmatpush.bf16.msra.mxu2 %v389_v4  ;;  %408 = vmatpush.bf16.msra.mxu3 %v389_v4 }
  0x14   :  { %v44_v24 = vld [vmem:[#allocation2 + $0x60] sm:$0xff] }
  0x15   :  { %v45_v40 = vld [vmem:[#allocation2 + $0x68] sm:$0xff] }
  0x16   :  { %181 = vmatpush.bf16.msra.mxu0 %v388_v5  ;;  %409 = vmatpush.bf16.msra.mxu1 %v388_v5  ;;  %v46_v58 = vld [vmem:[#allocation2 + $0x70] sm:$0xff] }
  0x17   :  { %410 = vmatpush.bf16.msra.mxu2 %v388_v5  ;;  %411 = vmatpush.bf16.msra.mxu3 %v388_v5 }
  0x1a   :  { %182 = vmatpush.bf16.msra.mxu0 %v387_v7  ;;  %412 = vmatpush.bf16.msra.mxu1 %v387_v7 }
  0x1b   :  { %413 = vmatpush.bf16.msra.mxu2 %v387_v7  ;;  %414 = vmatpush.bf16.msra.mxu3 %v387_v7 }
  0x1e   :  { %183 = vmatpush.bf16.msra.mxu0 %v386_v8  ;;  %415 = vmatpush.bf16.msra.mxu1 %v386_v8 }
  0x1f   :  { %416 = vmatpush.bf16.msra.mxu2 %v386_v8  ;;  %417 = vmatpush.bf16.msra.mxu3 %v386_v8 }
  0x21   :  { %184 = vmatmul.bf16.vlgmr.msra.gmra.mxu0 %v378_v9  ;;  %194 = vmatmul.bf16.vlgmr.msra.gmra.mxu1 %v380_v10 }
  0x22   :  { %204 = vmatmul.bf16.vlgmr.msra.gmra.mxu2 %v382_v11  ;;  %214 = vmatmul.bf16.vlgmr.msra.gmra.mxu3 %v384_v12  ;;  %v43_v11 = vld [vmem:[#allocation2 + $0x58] sm:$0xff] }
  0x31   :  { %189 = vmatmul.bf16.gmra.mxu0 %v379_v13  ;;  %199 = vmatmul.bf16.gmra.mxu1 %v381_v14 }
  0x32   :  { %209 = vmatmul.bf16.gmra.mxu2 %v383_v15  ;;  %219 = vmatmul.bf16.gmra.mxu3 %v385_v16  ;;  %v47_v16 = vld [vmem:[#allocation2 + $0x78] sm:$0xff] }
  0x9e   :  { %v185_v19 = vpop.f32.mrf.mxu0  ;;  %v195_v20 = vpop.f32.mrf.mxu1 }
  0x9f   :  { %v225_v21 = vadd.f32 %v185_v19, %v32_v17  ;;  %v229_v22 = vadd.f32 %v195_v20, %v36_v18 }
  0xa1   :  { %242 = vst.msk [vmem:[#allocation2] sm:$0xff] %vm15_vm0, %v225_v21 }
  0xa2   :  { %246 = vst.msk [vmem:[#allocation2 + $0x20] sm:$0xff] %vm15_vm0, %v229_v22 }
  0xa5   :  { %v205_v26 = vpop.f32.mrf.mxu2  ;;  %v215_v27 = vpop.f32.mrf.mxu3 }
  0xa6   :  { %v233_v28 = vadd.f32 %v205_v26, %v40_v23  ;;  %v237_v29 = vadd.f32 %v215_v27, %v44_v24  ;;  %v187_v30 = vpop.f32.mrf.mxu0  ;;  %v197_v32 = vpop.f32.mrf.mxu1 }
  0xa7   :  { %v226_v33 = vadd.f32 %v187_v30, %v33_v25  ;;  %v230_v37 = vadd.f32 %v197_v32, %v37_v31 }
  0xa8   :  { %v261_v34 = vld [vmem:[#allocation2] sm:$0xff]  ;;  %250 = vst.msk [vmem:[#allocation2 + $0x40] sm:$0xff] %vm15_vm0, %v233_v28 }
  0xa9   :  { %v277_v35 = vpack.c.bf16 %v261_v34, %v261_v34  ;;  %v265_v36 = vld [vmem:[#allocation2 + $0x20] sm:$0xff]  ;;  %254 = vst.msk [vmem:[#allocation2 + $0x60] sm:$0xff] %vm15_vm0, %v237_v29 }
  0xaa   :  { %v281_v38 = vpack.c.bf16 %v265_v36, %v265_v36  ;;  %243 = vst.msk [vmem:[#allocation2 + $0x8] sm:$0xff] %vm15_vm0, %v226_v33 }
  0xab   :  { %294 = vst.msk [vmem:[%s581_s2] sm:$0xf] %vm293_vm1, %v277_v35 }
  0xac   :  { %298 = vst.msk [vmem:[%s581_s2 + $0x10] sm:$0xf] %vm293_vm1, %v281_v38 }
  0xad   :  { %247 = vst.msk [vmem:[#allocation2 + $0x28] sm:$0xff] %vm15_vm0, %v230_v37  ;;  %v207_v41 = vpop.f32.mrf.mxu2  ;;  %v217_v42 = vpop.f32.mrf.mxu3 }
  0xae   :  { %v234_v43 = vadd.f32 %v207_v41, %v41_v39  ;;  %v238_v44 = vadd.f32 %v217_v42, %v45_v40  ;;  %v190_v46 = vpop.f32.mrf.mxu0  ;;  %v200_v47 = vpop.f32.mrf.mxu1 }
  0xaf   :  { %v269_v48 = vld [vmem:[#allocation2 + $0x40] sm:$0xff]  ;;  %v227_v54 = vadd.f32 %v190_v46, %v34_v45  ;;  %v231_v56 = vadd.f32 %v200_v47, %v38_v49 }
  0xb0   :  { %v285_v50 = vpack.c.bf16 %v269_v48, %v269_v48  ;;  %v273_v51 = vld [vmem:[#allocation2 + $0x60] sm:$0xff]  ;;  %251 = vst.msk [vmem:[#allocation2 + $0x48] sm:$0xff] %vm15_vm0, %v234_v43 }
  0xb1   :  { %v289_v52 = vpack.c.bf16 %v273_v51, %v273_v51  ;;  %v262_v53 = vld [vmem:[#allocation2 + $0x8] sm:$0xff]  ;;  %255 = vst.msk [vmem:[#allocation2 + $0x68] sm:$0xff] %vm15_vm0, %v238_v44 }
  0xb2   :  { %302 = vst.msk [vmem:[%s581_s2 + $0x20] sm:$0xf] %vm293_vm1, %v285_v50  ;;  %v278_v55 = vpack.c.bf16 %v262_v53, %v262_v53 }
  0xb3   :  { %306 = vst.msk [vmem:[%s581_s2 + $0x30] sm:$0xf] %vm293_vm1, %v289_v52 }
  0xb4   :  { %295 = vst.msk [vmem:[%s581_s2 + $0x4] sm:$0xf] %vm293_vm1, %v278_v55  ;;  %v266_v59 = vld [vmem:[#allocation2 + $0x28] sm:$0xff] }
  0xb5   :  { %v282_v60 = vpack.c.bf16 %v266_v59, %v266_v59  ;;  %244 = vst.msk [vmem:[#allocation2 + $0x10] sm:$0xff] %vm15_vm0, %v227_v54  ;;  %v210_v61 = vpop.f32.mrf.mxu2  ;;  %v220_v62 = vpop.f32.mrf.mxu3 }
  0xb6   :  { %248 = vst.msk [vmem:[#allocation2 + $0x30] sm:$0xff] %vm15_vm0, %v231_v56  ;;  %v235_v0 = vadd.f32 %v210_v61, %v42_v57  ;;  %v239_v1 = vadd.f32 %v220_v62, %v46_v58  ;;  %v192_v2 = vpop.f32.mrf.mxu0  ;;  %v202_v4 = vpop.f32.mrf.mxu1 }
  0xb7   :  { %299 = vst.msk [vmem:[%s581_s2 + $0x14] sm:$0xf] %vm293_vm1, %v282_v60  ;;  %v270_v5 = vld [vmem:[#allocation2 + $0x48] sm:$0xff]  ;;  %v228_v8 = vadd.f32 %v192_v2, %v35_v63  ;;  %v232_v10 = vadd.f32 %v202_v4, %v39_v3 }
  0xb8   :  { %v286_v6 = vpack.c.bf16 %v270_v5, %v270_v5  ;;  %v274_v7 = vld [vmem:[#allocation2 + $0x68] sm:$0xff]  ;;  %252 = vst.msk [vmem:[#allocation2 + $0x50] sm:$0xff] %vm15_vm0, %v235_v0 }
  0xb9   :  { %v290_v9 = vpack.c.bf16 %v274_v7, %v274_v7  ;;  %256 = vst.msk [vmem:[#allocation2 + $0x70] sm:$0xff] %vm15_vm0, %v239_v1 }
  0xba   :  { %303 = vst.msk [vmem:[%s581_s2 + $0x24] sm:$0xf] %vm293_vm1, %v286_v6 }
  0xbb   :  { %307 = vst.msk [vmem:[%s581_s2 + $0x34] sm:$0xf] %vm293_vm1, %v290_v9 }
  0xbc   :  { %v263_v12 = vld [vmem:[#allocation2 + $0x10] sm:$0xff]  ;;  %245 = vst.msk [vmem:[#allocation2 + $0x18] sm:$0xff] %vm15_vm0, %v228_v8 }
  0xbd   :  { %v279_v13 = vpack.c.bf16 %v263_v12, %v263_v12  ;;  %v267_v14 = vld [vmem:[#allocation2 + $0x30] sm:$0xff]  ;;  %249 = vst.msk [vmem:[#allocation2 + $0x38] sm:$0xff] %vm15_vm0, %v232_v10  ;;  %v212_v15 = vpop.f32.mrf.mxu2  ;;  %v222_v17 = vpop.f32.mrf.mxu3 }
  0xbe   :  { %v283_v18 = vpack.c.bf16 %v267_v14, %v267_v14  ;;  %v236_v19 = vadd.f32 %v212_v15, %v43_v11  ;;  %v240_v23 = vadd.f32 %v222_v17, %v47_v16 }
  0xbf   :  { %296 = vst.msk [vmem:[%s581_s2 + $0x8] sm:$0xf] %vm293_vm1, %v279_v13  ;;  %v271_v20 = vld [vmem:[#allocation2 + $0x50] sm:$0xff] }
  0xc0   :  { %300 = vst.msk [vmem:[%s581_s2 + $0x18] sm:$0xf] %vm293_vm1, %v283_v18  ;;  %v287_v21 = vpack.c.bf16 %v271_v20, %v271_v20  ;;  %v275_v22 = vld [vmem:[#allocation2 + $0x70] sm:$0xff] }
  0xc1   :  { %v291_v24 = vpack.c.bf16 %v275_v22, %v275_v22  ;;  %253 = vst.msk [vmem:[#allocation2 + $0x58] sm:$0xff] %vm15_vm0, %v236_v19 }
  0xc2   :  { %304 = vst.msk [vmem:[%s581_s2 + $0x28] sm:$0xf] %vm293_vm1, %v287_v21 }
  0xc3   :  { %308 = vst.msk [vmem:[%s581_s2 + $0x38] sm:$0xf] %vm293_vm1, %v291_v24  ;;  %v264_v25 = vld [vmem:[#allocation2 + $0x18] sm:$0xff] }
  0xc4   :  { %v280_v26 = vpack.c.bf16 %v264_v25, %v264_v25  ;;  %v268_v27 = vld [vmem:[#allocation2 + $0x38] sm:$0xff]  ;;  %257 = vst.msk [vmem:[#allocation2 + $0x78] sm:$0xff] %vm15_vm0, %v240_v23 }
  0xc5   :  { %v284_v28 = vpack.c.bf16 %v268_v27, %v268_v27 }
  0xc6   :  { %297 = vst.msk [vmem:[%s581_s2 + $0xc] sm:$0xf] %vm293_vm1, %v280_v26 }
  0xc7   :  { %301 = vst.msk [vmem:[%s581_s2 + $0x1c] sm:$0xf] %vm293_vm1, %v284_v28 }
  0xc8   :  { %v272_v29 = vld [vmem:[#allocation2 + $0x58] sm:$0xff] }
  0xc9   :  { %v288_v30 = vpack.c.bf16 %v272_v29, %v272_v29 }
  0xcb   :  { %305 = vst.msk [vmem:[%s581_s2 + $0x2c] sm:$0xf] %vm293_vm1, %v288_v30  ;;  %v276_v31 = vld [vmem:[#allocation2 + $0x78] sm:$0xff] }
  0xcc   :  { %v292_v32 = vpack.c.bf16 %v276_v31, %v276_v31 }
  0xce   :  { %309 = vst.msk [vmem:[%s581_s2 + $0x3c] sm:$0xf] %vm293_vm1, %v292_v32 }

// kernel: multichev_forward.3
= control target key start
LH: loop header
LB: loop body
LE: loop exit
PB: predicated region body
PF: predicated region fallthrough
CT: control target
= control target key end

     0   :  { %vm33_vm0 = vcmask 64512   ;;  %v2424_v49 = vmov 0.0   ;;  %s4346_s5 = inlined_call_operand.vmem [shape: f32[8,768], index: 5, kind: input, shape index: {}]   ;;  %s4347_s1 = inlined_call_operand.vmem [shape: bf16[128,8], index: 1, kind: input, shape index: {}, may-alias: {1,3}]   ;;  %s4348_s3 = inlined_call_operand.vmem [shape: bf16[128,8], index: 3, kind: input, shape index: {}, may-alias: {1,3}]   ;;  %s4349_s0 = inlined_call_operand.vmem [shape: bf16[128,128], index: 0, kind: input, shape index: {}]   ;;  %s4350_s4 = inlined_call_operand.vmem [shape: f32[8,768], index: 4, kind: input, shape index: {}]   ;;  %s4351_s6 = inlined_call_operand.vmem [shape: f32[8,768], index: 6, kind: input, shape index: {}]   ;;  %s4352_s2 = inlined_call_operand.vmem [shape: f32[128,8], index: 2, kind: input, shape index: {}]   ;;  %s4353_s7 = inlined_call_operand.vmem [shape: f32[1,768], index: 7, kind: input, shape index: {}]   ;;  %s4354_s8 = inlined_call_operand.vmem [shape: f32[128,768], index: 8, kind: output, shape index: {}]  }
   0x1   :  { %v381_v0 = vld [vmem:[%s4346_s5] sm:$0xff]  ;;  %v382_v1 = vld [vmem:[%s4346_s5 + $0x8] sm:$0xff]  ;;  %v2479_v2 = vld [vmem:[%s4346_s5 + $0x10] sm:$0xff]  ;;  %34 = vst.msk [vmem:[#allocation2] sm:$0xff] %vm33_vm0, %v2424_v49 }
   0x2   :  { %2420 = vmatpush.msra.mxu1 %v381_v0  ;;  %2421 = vmatpush.msra.mxu2 %v382_v1  ;;  %v2380_v3 = vld [vmem:[%s4347_s1 + $0x38] sm:$0xff]  ;;  %v2487_v4 = vld [vmem:[%s4348_s3 + $0x8] sm:$0xff]   ;;  %v385_v5 = vld [vmem:[%s4346_s5 + $0x20] sm:$0xff]  ;;  %35 = vst.msk [vmem:[#allocation2 + $0x8] sm:$0xff] %vm33_vm0, %v2424_v49 }
   0x3   :  { %2422 = vmatpush.msra.mxu3 %v2479_v2  ;;  %v2494_v6 = vunpack.c.h.bf16 %v2487_v4  ;;  %v386_v7 = vld [vmem:[%s4346_s5 + $0x28] sm:$0xff]  ;;  %v384_v8 = vld [vmem:[%s4346_s5 + $0x18] sm:$0xff]  ;;  %194 = vmatpush.bf16.msra.mxu0 %v2380_v3  ;;  %v2379_v9 = vld [vmem:[%s4347_s1 + $0x30] sm:$0xff]  ;;  %v2690_v46 = vunpack.c.l.bf16 %v2487_v4  ;;  %36 = vst.msk [vmem:[#allocation2 + $0x10] sm:$0xff] %vm33_vm0, %v2424_v49 }
   0x4   :  { %710 = vmatpush.msrb.mxu2 %v385_v5  ;;  %645 = vmatpush.msrb.mxu1 %v384_v8  ;;  %v2414_v10 = vld [vmem:[%s4348_s3 + $0x10] sm:$0xff]   ;;  %v2378_v11 = vld [vmem:[%s4347_s1 + $0x28] sm:$0xff]  ;;  %v2377_v13 = vld [vmem:[%s4347_s1 + $0x20] sm:$0xff]  ;;  %37 = vst.msk [vmem:[#allocation2 + $0x18] sm:$0xff] %vm33_vm0, %v2424_v49 }
   0x5   :  { %775 = vmatpush.msrb.mxu3 %v386_v7  ;;  %2080 = vmatmul.msk.f32.vlgmr.msra.gmra.mxu1 %vm33_vm0, %v2494_v6  ;;  %v2517_v12 = vunpack.c.l.bf16 %v2414_v10  ;;  %v2376_v14 = vld [vmem:[%s4347_s1 + $0x18] sm:$0xff]  ;;  %v2531_v15 = vunpack.c.h.bf16 %v2414_v10  ;;  %v2375_v16 = vld [vmem:[%s4347_s1 + $0x10] sm:$0xff]  ;;  %v2374_v18 = vld [vmem:[%s4347_s1 + $0x8] sm:$0xff]  ;;  %38 = vst.msk [vmem:[#allocation2 + $0x20] sm:$0xff] %vm33_vm0, %v2424_v49 }
   0x6   :  { %2096 = vmatmul.msk.f32.vlgmr.msra.gmra.mxu2 %vm33_vm0, %v2494_v6  ;;  %2112 = vmatmul.msk.f32.vlgmr.msra.gmra.mxu3 %vm33_vm0, %v2494_v6  ;;  %v2415_v17 = vld [vmem:[%s4348_s3 + $0x18] sm:$0xff]   ;;  %v2373_v20 = vld [vmem:[%s4347_s1] sm:$0xff]  ;;  %v2366_v25 = vld [vmem:[%s4349_s0 + $0x8] sm:$0xff]  ;;  %39 = vst.msk [vmem:[#allocation2 + $0x28] sm:$0xff] %vm33_vm0, %v2424_v49 }
   0x7   :  { %195 = vmatpush.bf16.msra.mxu0 %v2379_v9  ;;  %v2548_v19 = vunpack.c.l.bf16 %v2415_v17  ;;  %v2365_v21 = vld [vmem:[%s4349_s0] sm:$0xff]  ;;  %v2562_v22 = vunpack.c.h.bf16 %v2415_v17  ;;  %v2417_v27 = vld [vmem:[%s4348_s3 + $0x28] sm:$0xff]   ;;  %v2367_v29 = vld [vmem:[%s4349_s0 + $0x10] sm:$0xff]  ;;  %40 = vst.msk [vmem:[#allocation2 + $0x30] sm:$0xff] %vm33_vm0, %v2424_v49 }
   0x8   :  { %v2416_v23 = vld [vmem:[%s4348_s3 + $0x20] sm:$0xff]   ;;  %v2595_v28 = vunpack.c.l.bf16 %v2417_v27  ;;  %v2606_v30 = vunpack.c.h.bf16 %v2417_v27  ;;  %v2418_v31 = vld [vmem:[%s4348_s3 + $0x30] sm:$0xff]   ;;  %v378_v34 = vld [vmem:[%s4350_s4 + $0x18] sm:$0xff]  ;;  %41 = vst.msk [vmem:[#allocation2 + $0x38] sm:$0xff] %vm33_vm0, %v2424_v49 }
   0x9   :  { %v2573_v24 = vunpack.c.l.bf16 %v2416_v23  ;;  %v2584_v26 = vunpack.c.h.bf16 %v2416_v23  ;;  %v2617_v32 = vunpack.c.l.bf16 %v2418_v31  ;;  %v377_v33 = vld [vmem:[%s4350_s4 + $0x10] sm:$0xff]  ;;  %v376_v35 = vld [vmem:[%s4350_s4 + $0x8] sm:$0xff]  ;;  %v2368_v36 = vld [vmem:[%s4349_s0 + $0x18] sm:$0xff]  ;;  %1083 = vmatpush.msra.mxu3 %v378_v34  ;;  %v2637_v37 = vunpack.c.h.bf16 %v2418_v31  ;;  %42 = vst.msk [vmem:[#allocation2 + $0x40] sm:$0xff] %vm33_vm0, %v2424_v49 }
   0xa   :  { %1018 = vmatpush.msra.mxu2 %v377_v33  ;;  %953 = vmatpush.msra.mxu1 %v376_v35  ;;  %v2419_v38 = vld [vmem:[%s4348_s3 + $0x38] sm:$0xff]   ;;  %v2369_v40 = vld [vmem:[%s4349_s0 + $0x20] sm:$0xff]  ;;  %v2370_v44 = vld [vmem:[%s4349_s0 + $0x28] sm:$0xff]  ;;  %43 = vst.msk [vmem:[#allocation2 + $0x48] sm:$0xff] %vm33_vm0, %v2424_v49 }
   0xb   :  { %196 = vmatpush.bf16.msra.mxu0 %v2378_v11  ;;  %v2648_v39 = vunpack.c.l.bf16 %v2419_v38  ;;  %v2659_v41 = vunpack.c.h.bf16 %v2419_v38  ;;  %v2382_v42 = vld [vmem:[%s4348_s3] sm:$0xff]   ;;  %v2371_v47 = vld [vmem:[%s4349_s0 + $0x30] sm:$0xff]  ;;  %44 = vst.msk [vmem:[#allocation2 + $0x50] sm:$0xff] %vm33_vm0, %v2424_v49  ;;  %v2372_v53 = vld [vmem:[%s4349_s0 + $0x38] sm:$0xff] }
   0xc   :  { %v2670_v43 = vunpack.c.l.bf16 %v2382_v42  ;;  %v2681_v45 = vunpack.c.h.bf16 %v2382_v42  ;;  %45 = vst.msk [vmem:[#allocation2 + $0x58] sm:$0xff] %vm33_vm0, %v2424_v49  ;;  %v50_v60 = vld [vmem:[#allocation2] sm:$0xff]  ;;  %v51_v3 = vld [vmem:[#allocation2 + $0x8] sm:$0xff] }
   0xd   :  { %2081 = vmatmul.msk.f32.gmra.mxu1 %vm33_vm0, %v2517_v12  ;;  %46 = vst.msk [vmem:[#allocation2 + $0x60] sm:$0xff] %vm33_vm0, %v2424_v49  ;;  %v55_v27 = vld [vmem:[#allocation2 + $0x28] sm:$0xff]  ;;  %v1263_v35 = vld [vmem:[%s4351_s6] sm:$0xff] }
   0xe   :  { %2097 = vmatmul.msk.f32.gmra.mxu2 %vm33_vm0, %v2517_v12  ;;  %2113 = vmatmul.msk.f32.gmra.mxu3 %vm33_vm0, %v2517_v12  ;;  %47 = vst.msk [vmem:[#allocation2 + $0x68] sm:$0xff] %vm33_vm0, %v2424_v49 }
   0xf   :  { %197 = vmatpush.bf16.msra.mxu0 %v2377_v13  ;;  %48 = vst.msk [vmem:[#allocation2 + $0x70] sm:$0xff] %vm33_vm0, %v2424_v49 }
  0x10   :  { %49 = vst.msk [vmem:[#allocation2 + $0x78] sm:$0xff] %vm33_vm0, %v2424_v49  ;;  %v380_v49 = vld [vmem:[%s4350_s4 + $0x28] sm:$0xff] }
  0x13   :  { %198 = vmatpush.bf16.msra.mxu0 %v2376_v14  ;;  %v53_v14 = vld [vmem:[#allocation2 + $0x18] sm:$0xff] }
  0x15   :  { %2082 = vmatmul.msk.f32.gmra.mxu1 %vm33_vm0, %v2531_v15 }
  0x16   :  { %2098 = vmatmul.msk.f32.gmra.mxu2 %vm33_vm0, %v2531_v15  ;;  %2114 = vmatmul.msk.f32.gmra.mxu3 %vm33_vm0, %v2531_v15 }
  0x17   :  { %199 = vmatpush.bf16.msra.mxu0 %v2375_v16 }
  0x1b   :  { %200 = vmatpush.bf16.msra.mxu0 %v2374_v18 }
  0x1d   :  { %2083 = vmatmul.msk.f32.gmra.mxu1 %vm33_vm0, %v2548_v19 }
  0x1e   :  { %2099 = vmatmul.msk.f32.gmra.mxu2 %vm33_vm0, %v2548_v19  ;;  %2115 = vmatmul.msk.f32.gmra.mxu3 %vm33_vm0, %v2548_v19 }
  0x1f   :  { %201 = vmatpush.bf16.msra.mxu0 %v2373_v20  ;;  %v375_v20 = vld [vmem:[%s4350_s4] sm:$0xff] }
  0x22   :  { %202 = vmatmul.bf16.vlgmr.msra.gmra.mxu0 %v2365_v21  ;;  %v54_v21 = vld [vmem:[#allocation2 + $0x20] sm:$0xff] }
  0x23   :  { %450 = vmatpush.msrb.mxu0 %v381_v0 }
  0x25   :  { %515 = vmatpush.msra.mxu0 %v382_v1  ;;  %2084 = vmatmul.msk.f32.gmra.mxu1 %vm33_vm0, %v2562_v22 }
  0x26   :  { %2100 = vmatmul.msk.f32.gmra.mxu2 %vm33_vm0, %v2562_v22  ;;  %2116 = vmatmul.msk.f32.gmra.mxu3 %vm33_vm0, %v2562_v22 }
  0x2d   :  { %2085 = vmatmul.msk.f32.gmra.mxu1 %vm33_vm0, %v2573_v24 }
  0x2e   :  { %2101 = vmatmul.msk.f32.gmra.mxu2 %vm33_vm0, %v2573_v24  ;;  %2117 = vmatmul.msk.f32.gmra.mxu3 %vm33_vm0, %v2573_v24 }
  0x32   :  { %207 = vmatmul.bf16.gmra.mxu0 %v2366_v25 }
  0x35   :  { %2086 = vmatmul.msk.f32.gmra.mxu1 %vm33_vm0, %v2584_v26 }
  0x36   :  { %2102 = vmatmul.msk.f32.gmra.mxu2 %vm33_vm0, %v2584_v26  ;;  %2118 = vmatmul.msk.f32.gmra.mxu3 %vm33_vm0, %v2584_v26 }
  0x3d   :  { %2087 = vmatmul.msk.f32.gmra.mxu1 %vm33_vm0, %v2595_v28 }
  0x3e   :  { %2103 = vmatmul.msk.f32.gmra.mxu2 %vm33_vm0, %v2595_v28  ;;  %2119 = vmatmul.msk.f32.gmra.mxu3 %vm33_vm0, %v2595_v28 }
  0x42   :  { %212 = vmatmul.bf16.gmra.mxu0 %v2367_v29 }
  0x45   :  { %2088 = vmatmul.msk.f32.gmra.mxu1 %vm33_vm0, %v2606_v30 }
  0x46   :  { %2104 = vmatmul.msk.f32.gmra.mxu2 %vm33_vm0, %v2606_v30  ;;  %2120 = vmatmul.msk.f32.gmra.mxu3 %vm33_vm0, %v2606_v30 }
  0x4d   :  { %2089 = vmatmul.msk.f32.gmra.mxu1 %vm33_vm0, %v2617_v32 }
  0x4e   :  { %2105 = vmatmul.msk.f32.gmra.mxu2 %vm33_vm0, %v2617_v32  ;;  %2121 = vmatmul.msk.f32.gmra.mxu3 %vm33_vm0, %v2617_v32 }
  0x52   :  { %217 = vmatmul.bf16.gmra.mxu0 %v2368_v36  ;;  %v1264_v36 = vld [vmem:[%s4351_s6 + $0x8] sm:$0xff] }
  0x55   :  { %2090 = vmatmul.msk.f32.gmra.mxu1 %vm33_vm0, %v2637_v37 }
  0x56   :  { %2106 = vmatmul.msk.f32.gmra.mxu2 %vm33_vm0, %v2637_v37  ;;  %2122 = vmatmul.msk.f32.gmra.mxu3 %vm33_vm0, %v2637_v37 }
  0x5d   :  { %2091 = vmatmul.msk.f32.gmra.mxu1 %vm33_vm0, %v2648_v39 }
  0x5e   :  { %2107 = vmatmul.msk.f32.gmra.mxu2 %vm33_vm0, %v2648_v39  ;;  %2123 = vmatmul.msk.f32.gmra.mxu3 %vm33_vm0, %v2648_v39 }
  0x62   :  { %222 = vmatmul.bf16.gmra.mxu0 %v2369_v40 }
  0x65   :  { %2092 = vmatmul.msk.f32.gmra.mxu1 %vm33_vm0, %v2659_v41 }
  0x66   :  { %2108 = vmatmul.msk.f32.gmra.mxu2 %vm33_vm0, %v2659_v41  ;;  %2124 = vmatmul.msk.f32.gmra.mxu3 %vm33_vm0, %v2659_v41 }
  0x6d   :  { %2125 = vmatmul.msk.f32.vlgmr.msrb.gmra.mxu1 %vm33_vm0, %v2670_v43 }
  0x6e   :  { %2141 = vmatmul.msk.f32.vlgmr.msrb.gmra.mxu2 %vm33_vm0, %v2670_v43  ;;  %2157 = vmatmul.msk.f32.vlgmr.msrb.gmra.mxu3 %vm33_vm0, %v2670_v43 }
  0x6f   :  { %1332 = vmatpush.msrb.mxu2 %v1263_v35  ;;  %1397 = vmatpush.msrb.mxu3 %v1264_v36 }
  0x70   :  { %1213 = vmatpush.msrb.mxu1 %v380_v49  ;;  %v2964_v49 = vld [vmem:[%s4352_s2 + $0x10] sm:$0xff] }
  0x72   :  { %227 = vmatmul.bf16.gmra.mxu0 %v2370_v44 }
  0x75   :  { %2126 = vmatmul.msk.f32.gmra.mxu1 %vm33_vm0, %v2681_v45 }
  0x76   :  { %2142 = vmatmul.msk.f32.gmra.mxu2 %vm33_vm0, %v2681_v45  ;;  %2158 = vmatmul.msk.f32.gmra.mxu3 %vm33_vm0, %v2681_v45 }
  0x7d   :  { %2127 = vmatmul.msk.f32.gmra.mxu1 %vm33_vm0, %v2690_v46 }
  0x7e   :  { %2143 = vmatmul.msk.f32.gmra.mxu2 %vm33_vm0, %v2690_v46  ;;  %2159 = vmatmul.msk.f32.gmra.mxu3 %vm33_vm0, %v2690_v46 }
  0x82   :  { %v2701_v48 = vpop.f32.mrf.mxu1  ;;  %232 = vmatmul.bf16.gmra.mxu0 %v2371_v47 }
  0x85   :  { %2128 = vmatmul.msk.f32.gmra.mxu1 %vm33_vm0, %v2494_v6 }
  0x86   :  { %2144 = vmatmul.msk.f32.gmra.mxu2 %vm33_vm0, %v2494_v6  ;;  %2160 = vmatmul.msk.f32.gmra.mxu3 %vm33_vm0, %v2494_v6 }
  0x89   :  { %v2715_v50 = vpop.f32.mrf.mxu2  ;;  %v2718_v51 = vpop.f32.mrf.mxu3 }
  0x8a   :  { %4361 = vst [vmem:[#allocation3_spill] sm:$0xff] %v2718_v51  ;;  %v2721_v52 = vpop.f32.mrf.mxu1 }
  0x8d   :  { %2129 = vmatmul.msk.f32.gmra.mxu1 %vm33_vm0, %v2517_v12 }
  0x8e   :  { %2145 = vmatmul.msk.f32.gmra.mxu2 %vm33_vm0, %v2517_v12  ;;  %2161 = vmatmul.msk.f32.gmra.mxu3 %vm33_vm0, %v2517_v12 }
  0x91   :  { %v2738_v54 = vpop.f32.mrf.mxu2  ;;  %v2741_v55 = vpop.f32.mrf.mxu3 }
  0x92   :  { %4362 = vst [vmem:[#allocation4_spill] sm:$0xff] %v2741_v55  ;;  %v2744_v56 = vpop.f32.mrf.mxu1  ;;  %237 = vmatmul.bf16.gmra.mxu0 %v2372_v53 }
  0x95   :  { %2130 = vmatmul.msk.f32.gmra.mxu1 %vm33_vm0, %v2531_v15 }
  0x96   :  { %2146 = vmatmul.msk.f32.gmra.mxu2 %vm33_vm0, %v2531_v15  ;;  %2162 = vmatmul.msk.f32.gmra.mxu3 %vm33_vm0, %v2531_v15 }
  0x99   :  { %v2752_v57 = vpop.f32.mrf.mxu2  ;;  %v2754_v58 = vpop.f32.mrf.mxu3 }
  0x9a   :  { %4363 = vst [vmem:[#allocation5_spill] sm:$0xff] %v2754_v58  ;;  %v2756_v59 = vpop.f32.mrf.mxu1 }
  0x9d   :  { %2131 = vmatmul.msk.f32.gmra.mxu1 %vm33_vm0, %v2548_v19 }
  0x9e   :  { %2147 = vmatmul.msk.f32.gmra.mxu2 %vm33_vm0, %v2548_v19  ;;  %2163 = vmatmul.msk.f32.gmra.mxu3 %vm33_vm0, %v2548_v19 }
  0x9f   :  { %v203_v62 = vpop.f32.mrf.mxu0 }
  0xa0   :  { %v243_v0 = vadd.f32 %v203_v62, %v50_v60 }
  0xa1   :  { %v2764_v61 = vpop.f32.mrf.mxu2  ;;  %v2766_v63 = vpop.f32.mrf.mxu3 }
  0xa2   :  { %4364 = vst [vmem:[#allocation6_spill] sm:$0xff] %v2766_v63  ;;  %v2768_v1 = vpop.f32.mrf.mxu1  ;;  %2077 = vmatmul.msk.f32.vlgmr.msrb.gmra.mxu0 %vm33_vm0, %v2670_v43 }
  0xa3   :  { %260 = vst.msk [vmem:[#allocation2] sm:$0xff] %vm33_vm0, %v243_v0  ;;  %580 = vmatpush.msrb.mxu0 %v2479_v2  ;;  %v52_v2 = vld [vmem:[#allocation2 + $0x10] sm:$0xff] }
  0xa5   :  { %2132 = vmatmul.msk.f32.gmra.mxu1 %vm33_vm0, %v2562_v22 }
  0xa6   :  { %2148 = vmatmul.msk.f32.gmra.mxu2 %vm33_vm0, %v2562_v22  ;;  %2164 = vmatmul.msk.f32.gmra.mxu3 %vm33_vm0, %v2562_v22 }
  0xa7   :  { %v205_v5 = vpop.f32.mrf.mxu0 }
  0xa8   :  { %v244_v7 = vadd.f32 %v205_v5, %v51_v3 }
  0xa9   :  { %v2780_v4 = vpop.f32.mrf.mxu2  ;;  %v2782_v6 = vpop.f32.mrf.mxu3 }
  0xaa   :  { %4365 = vst [vmem:[#allocation7_spill] sm:$0xff] %v2782_v6  ;;  %v2784_v8 = vpop.f32.mrf.mxu1  ;;  %2078 = vmatmul.msk.f32.gmra.mxu0 %vm33_vm0, %v2681_v45 }
  0xab   :  { %261 = vst.msk [vmem:[#allocation2 + $0x8] sm:$0xff] %vm33_vm0, %v244_v7 }
  0xad   :  { %2133 = vmatmul.msk.f32.gmra.mxu1 %vm33_vm0, %v2573_v24 }
  0xae   :  { %2149 = vmatmul.msk.f32.gmra.mxu2 %vm33_vm0, %v2573_v24  ;;  %2165 = vmatmul.msk.f32.gmra.mxu3 %vm33_vm0, %v2573_v24 }
  0xaf   :  { %v208_v10 = vpop.f32.mrf.mxu0 }
  0xb0   :  { %v245_v12 = vadd.f32 %v208_v10, %v52_v2 }
  0xb1   :  { %v2795_v9 = vpop.f32.mrf.mxu2  ;;  %v2797_v11 = vpop.f32.mrf.mxu3 }
  0xb2   :  { %4366 = vst [vmem:[#allocation8_spill] sm:$0xff] %v2797_v11  ;;  %v2799_v13 = vpop.f32.mrf.mxu1  ;;  %2079 = vmatmul.msk.f32.gmra.mxu0 %vm33_vm0, %v2690_v46 }
  0xb3   :  { %262 = vst.msk [vmem:[#allocation2 + $0x10] sm:$0xff] %vm33_vm0, %v245_v12 }
  0xb5   :  { %2134 = vmatmul.msk.f32.gmra.mxu1 %vm33_vm0, %v2584_v26 }
  0xb6   :  { %2150 = vmatmul.msk.f32.gmra.mxu2 %vm33_vm0, %v2584_v26  ;;  %2166 = vmatmul.msk.f32.gmra.mxu3 %vm33_vm0, %v2584_v26 }
  0xb7   :  { %v210_v16 = vpop.f32.mrf.mxu0 }
  0xb8   :  { %v246_v18 = vadd.f32 %v210_v16, %v53_v14 }
  0xb9   :  { %v2810_v15 = vpop.f32.mrf.mxu2  ;;  %v2812_v17 = vpop.f32.mrf.mxu3 }
  0xba   :  { %4367 = vst [vmem:[#allocation9_spill] sm:$0xff] %v2812_v17  ;;  %v2814_v19 = vpop.f32.mrf.mxu1  ;;  %2093 = vmatmul.msk.f32.vlgmr.msra.gmra.mxu0 %vm33_vm0, %v2670_v43 }
  0xbb   :  { %4368 = vst [vmem:[#allocation10_spill] sm:$0xff] %v2814_v19  ;;  %888 = vmatpush.msra.mxu0 %v375_v20 }
  0xbc   :  { %263 = vst.msk [vmem:[#allocation2 + $0x18] sm:$0xff] %vm33_vm0, %v246_v18 }
  0xbd   :  { %2135 = vmatmul.msk.f32.gmra.mxu1 %vm33_vm0, %v2595_v28 }
  0xbe   :  { %2151 = vmatmul.msk.f32.gmra.mxu2 %vm33_vm0, %v2595_v28  ;;  %2167 = vmatmul.msk.f32.gmra.mxu3 %vm33_vm0, %v2595_v28 }
  0xbf   :  { %v213_v23 = vpop.f32.mrf.mxu0 }
  0xc0   :  { %v247_v25 = vadd.f32 %v213_v23, %v54_v21 }
  0xc1   :  { %v2828_v22 = vpop.f32.mrf.mxu2  ;;  %v2830_v24 = vpop.f32.mrf.mxu3 }
  0xc2   :  { %4369 = vst [vmem:[#allocation11_spill] sm:$0xff] %v2828_v22  ;;  %v2832_v26 = vpop.f32.mrf.mxu1  ;;  %2094 = vmatmul.msk.f32.gmra.mxu0 %vm33_vm0, %v2681_v45 }
  0xc3   :  { %4370 = vst [vmem:[#allocation12_spill] sm:$0xff] %v2830_v24 }
  0xc4   :  { %4371 = vst [vmem:[#allocation13_spill] sm:$0xff] %v2832_v26 }
  0xc5   :  { %264 = vst.msk [vmem:[#allocation2 + $0x20] sm:$0xff] %vm33_vm0, %v247_v25  ;;  %2136 = vmatmul.msk.f32.gmra.mxu1 %vm33_vm0, %v2606_v30 }
  0xc6   :  { %2152 = vmatmul.msk.f32.gmra.mxu2 %vm33_vm0, %v2606_v30  ;;  %2168 = vmatmul.msk.f32.gmra.mxu3 %vm33_vm0, %v2606_v30  ;;  %v56_v30 = vld [vmem:[#allocation2 + $0x30] sm:$0xff] }
  0xc7   :  { %v215_v29 = vpop.f32.mrf.mxu0 }
  0xc8   :  { %v248_v33 = vadd.f32 %v215_v29, %v55_v27 }
  0xc9   :  { %v2843_v28 = vpop.f32.mrf.mxu2  ;;  %v2845_v31 = vpop.f32.mrf.mxu3 }
  0xca   :  { %4372 = vst [vmem:[#allocation14_spill] sm:$0xff] %v2843_v28  ;;  %v2847_v34 = vpop.f32.mrf.mxu1  ;;  %2095 = vmatmul.msk.f32.gmra.mxu0 %vm33_vm0, %v2690_v46 }
  0xcb   :  { %4373 = vst [vmem:[#allocation15_spill] sm:$0xff] %v2845_v31 }
  0xcc   :  { %4374 = vst [vmem:[#allocation16_spill] sm:$0xff] %v2847_v34 }
  0xcd   :  { %265 = vst.msk [vmem:[#allocation2 + $0x28] sm:$0xff] %vm33_vm0, %v248_v33  ;;  %2137 = vmatmul.msk.f32.gmra.mxu1 %vm33_vm0, %v2617_v32  ;;  %v2944_v33 = vld [vmem:[%s4352_s2 + $0x8] sm:$0xff] }
  0xce   :  { %2153 = vmatmul.msk.f32.gmra.mxu2 %vm33_vm0, %v2617_v32  ;;  %2169 = vmatmul.msk.f32.gmra.mxu3 %vm33_vm0, %v2617_v32  ;;  %v379_v32 = vld [vmem:[%s4350_s4 + $0x20] sm:$0xff] }
  0xcf   :  { %v218_v40 = vpop.f32.mrf.mxu0 }
  0xd0   :  { %v249_v44 = vadd.f32 %v218_v40, %v56_v30  ;;  %v61_v30 = vld [vmem:[#allocation2 + $0x58] sm:$0xff] }
  0xd1   :  { %v2864_v38 = vpop.f32.mrf.mxu2  ;;  %v2866_v42 = vpop.f32.mrf.mxu3 }
  0xd2   :  { %4375 = vst [vmem:[#allocation17_spill] sm:$0xff] %v2864_v38  ;;  %v2868_v47 = vpop.f32.mrf.mxu1  ;;  %2109 = vmatmul.msk.f32.vlgmr.msrb.gmra.mxu0 %vm33_vm0, %v2670_v43  ;;  %v57_v43 = vld [vmem:[#allocation2 + $0x38] sm:$0xff] }
  0xd3   :  { %4376 = vst [vmem:[#allocation18_spill] sm:$0xff] %v2866_v42  ;;  %1148 = vmatpush.msrb.mxu0 %v379_v32  ;;  %v3044_v42 = vld [vmem:[%s4352_s2 + $0x30] sm:$0xff] }
  0xd4   :  { %4377 = vst [vmem:[#allocation19_spill] sm:$0xff] %v2868_v47 }
  0xd5   :  { %266 = vst.msk [vmem:[#allocation2 + $0x30] sm:$0xff] %vm33_vm0, %v249_v44  ;;  %2138 = vmatmul.msk.f32.gmra.mxu1 %vm33_vm0, %v2637_v37 }
  0xd6   :  { %2154 = vmatmul.msk.f32.gmra.mxu2 %vm33_vm0, %v2637_v37  ;;  %2170 = vmatmul.msk.f32.gmra.mxu3 %vm33_vm0, %v2637_v37  ;;  %v58_v37 = vld [vmem:[#allocation2 + $0x40] sm:$0xff] }
  0xd7   :  { %v220_v60 = vpop.f32.mrf.mxu0 }
  0xd8   :  { %v250_v0 = vadd.f32 %v220_v60, %v57_v43  ;;  %v62_v43 = vld [vmem:[#allocation2 + $0x60] sm:$0xff] }
  0xd9   :  { %v2885_v53 = vpop.f32.mrf.mxu2  ;;  %v2887_v62 = vpop.f32.mrf.mxu3 }
  0xda   :  { %4378 = vst [vmem:[#allocation20_spill] sm:$0xff] %v2885_v53  ;;  %v2889_v3 = vpop.f32.mrf.mxu1  ;;  %2110 = vmatmul.msk.f32.gmra.mxu0 %vm33_vm0, %v2681_v45 }
  0xdb   :  { %4379 = vst [vmem:[#allocation21_spill] sm:$0xff] %v2887_v62 }
  0xdc   :  { %4380 = vst [vmem:[#allocation22_spill] sm:$0xff] %v2889_v3 }
  0xdd   :  { %267 = vst.msk [vmem:[#allocation2 + $0x38] sm:$0xff] %vm33_vm0, %v250_v0  ;;  %2139 = vmatmul.msk.f32.gmra.mxu1 %vm33_vm0, %v2648_v39 }
  0xde   :  { %2155 = vmatmul.msk.f32.gmra.mxu2 %vm33_vm0, %v2648_v39  ;;  %2171 = vmatmul.msk.f32.gmra.mxu3 %vm33_vm0, %v2648_v39  ;;  %v59_v39 = vld [vmem:[#allocation2 + $0x48] sm:$0xff] }
  0xdf   :  { %v223_v7 = vpop.f32.mrf.mxu0 }
  0xe0   :  { %v251_v10 = vadd.f32 %v223_v7, %v58_v37 }
  0xe1   :  { %v2900_v5 = vpop.f32.mrf.mxu2  ;;  %v2902_v2 = vpop.f32.mrf.mxu3 }
  0xe2   :  { %4381 = vst [vmem:[#allocation23_spill] sm:$0xff] %v2900_v5  ;;  %v2904_v12 = vpop.f32.mrf.mxu1  ;;  %2111 = vmatmul.msk.f32.gmra.mxu0 %vm33_vm0, %v2690_v46  ;;  %v2924_v46 = vld [vmem:[%s4352_s2] sm:$0xff] }
  0xe3   :  { %4382 = vst [vmem:[#allocation24_spill] sm:$0xff] %v2902_v2 }
  0xe4   :  { %4383 = vst [vmem:[#allocation25_spill] sm:$0xff] %v2904_v12 }
  0xe5   :  { %268 = vst.msk [vmem:[#allocation2 + $0x40] sm:$0xff] %vm33_vm0, %v251_v10  ;;  %2140 = vmatmul.msk.f32.gmra.mxu1 %vm33_vm0, %v2659_v41 }
  0xe6   :  { %2156 = vmatmul.msk.f32.gmra.mxu2 %vm33_vm0, %v2659_v41  ;;  %2172 = vmatmul.msk.f32.gmra.mxu3 %vm33_vm0, %v2659_v41  ;;  %v60_v41 = vld [vmem:[#allocation2 + $0x50] sm:$0xff] }
  0xe7   :  { %v225_v14 = vpop.f32.mrf.mxu0 }
  0xe8   :  { %v252_v18 = vadd.f32 %v225_v14, %v59_v39  ;;  %v2984_v39 = vld [vmem:[%s4352_s2 + $0x18] sm:$0xff]  ;;  %v63_v14 = vld [vmem:[#allocation2 + $0x68] sm:$0xff] }
  0xe9   :  { %v2915_v45 = vpop.f32.mrf.mxu2  ;;  %v2917_v16 = vpop.f32.mrf.mxu3 }
  0xea   :  { %4384 = vst [vmem:[#allocation26_spill] sm:$0xff] %v2915_v45  ;;  %v2919_v20 = vpop.f32.mrf.mxu1  ;;  %2173 = vmatmul.msk.f32.vlgmr.msra.gmra.mxu0 %vm33_vm0, %v2924_v46 }
  0xeb   :  { %4385 = vst [vmem:[#allocation27_spill] sm:$0xff] %v2917_v16 }
  0xec   :  { %4386 = vst [vmem:[#allocation28_spill] sm:$0xff] %v2919_v20  ;;  %v331_v20 = vld [vmem:[#allocation2 + $0x20] sm:$0xff] }
  0xed   :  { %269 = vst.msk [vmem:[#allocation2 + $0x48] sm:$0xff] %vm33_vm0, %v252_v18  ;;  %2189 = vmatmul.msk.f32.vlgmr.msra.gmra.mxu1 %vm33_vm0, %v2924_v46 }
  0xee   :  { %2205 = vmatmul.msk.f32.vlgmr.msra.gmra.mxu2 %vm33_vm0, %v2924_v46  ;;  %2221 = vmatmul.msk.f32.vlgmr.msra.gmra.mxu3 %vm33_vm0, %v2924_v46 }
  0xef   :  { %v228_v23 = vpop.f32.mrf.mxu0 }
  0xf0   :  { %v253_v27 = vadd.f32 %v228_v23, %v60_v41 }
  0xf1   :  { %v2935_v21 = vpop.f32.mrf.mxu2  ;;  %v2937_v25 = vpop.f32.mrf.mxu3 }
  0xf2   :  { %4387 = vst [vmem:[#allocation29_spill] sm:$0xff] %v2935_v21  ;;  %v2939_v29 = vpop.f32.mrf.mxu1  ;;  %2174 = vmatmul.msk.f32.gmra.mxu0 %vm33_vm0, %v2944_v33 }
  0xf3   :  { %4388 = vst [vmem:[#allocation30_spill] sm:$0xff] %v2937_v25  ;;  %v329_v25 = vld [vmem:[#allocation2 + $0x10] sm:$0xff] }
  0xf4   :  { %4389 = vst [vmem:[#allocation31_spill] sm:$0xff] %v2939_v29 }
  0xf5   :  { %270 = vst.msk [vmem:[#allocation2 + $0x50] sm:$0xff] %vm33_vm0, %v253_v27  ;;  %2190 = vmatmul.msk.f32.gmra.mxu1 %vm33_vm0, %v2944_v33 }
  0xf6   :  { %2206 = vmatmul.msk.f32.gmra.mxu2 %vm33_vm0, %v2944_v33  ;;  %2222 = vmatmul.msk.f32.gmra.mxu3 %vm33_vm0, %v2944_v33 }
  0xf7   :  { %v230_v36 = vpop.f32.mrf.mxu0 }
  0xf8   :  { %v254_v44 = vadd.f32 %v230_v36, %v61_v30  ;;  %v3004_v36 = vld [vmem:[%s4352_s2 + $0x20] sm:$0xff] }
  0xf9   :  { %v2955_v35 = vpop.f32.mrf.mxu2  ;;  %v2957_v40 = vpop.f32.mrf.mxu3 }
  0xfa   :  { %4390 = vst [vmem:[#allocation32_spill] sm:$0xff] %v2955_v35  ;;  %v2959_v32 = vpop.f32.mrf.mxu1  ;;  %2175 = vmatmul.msk.f32.gmra.mxu0 %vm33_vm0, %v2964_v49 }
  0xfb   :  { %4391 = vst [vmem:[#allocation33_spill] sm:$0xff] %v2957_v40  ;;  %v328_v40 = vld [vmem:[#allocation2 + $0x8] sm:$0xff] }
  0xfc   :  { %4392 = vst [vmem:[#allocation34_spill] sm:$0xff] %v2959_v32 }
  0xfd   :  { %271 = vst.msk [vmem:[#allocation2 + $0x58] sm:$0xff] %vm33_vm0, %v254_v44  ;;  %2191 = vmatmul.msk.f32.gmra.mxu1 %vm33_vm0, %v2964_v49  ;;  %v64_v44 = vld [vmem:[#allocation2 + $0x70] sm:$0xff] }
  0xfe   :  { %2207 = vmatmul.msk.f32.gmra.mxu2 %vm33_vm0, %v2964_v49  ;;  %2223 = vmatmul.msk.f32.gmra.mxu3 %vm33_vm0, %v2964_v49 }
  0xff   :  { %v233_v0 = vpop.f32.mrf.mxu0 }
 0x100   :  { %v255_v7 = vadd.f32 %v233_v0, %v62_v43 }
 0x101   :  { %v2975_v60 = vpop.f32.mrf.mxu2  ;;  %v2977_v37 = vpop.f32.mrf.mxu3 }
 0x102   :  { %4393 = vst [vmem:[#allocation35_spill] sm:$0xff] %v2975_v60  ;;  %v2979_v10 = vpop.f32.mrf.mxu1  ;;  %2176 = vmatmul.msk.f32.gmra.mxu0 %vm33_vm0, %v2984_v39 }
 0x103   :  { %4394 = vst [vmem:[#allocation36_spill] sm:$0xff] %v2977_v37  ;;  %v327_v37 = vld [vmem:[#allocation2] sm:$0xff] }
 0x104   :  { %4395 = vst [vmem:[#allocation37_spill] sm:$0xff] %v2979_v10  ;;  %v3240_v10 = vld [vmem:[%s4352_s2 + $0x78] sm:$0xff] }
 0x105   :  { %272 = vst.msk [vmem:[#allocation2 + $0x60] sm:$0xff] %vm33_vm0, %v255_v7  ;;  %2192 = vmatmul.msk.f32.gmra.mxu1 %vm33_vm0, %v2984_v39 }
 0x106   :  { %2208 = vmatmul.msk.f32.gmra.mxu2 %vm33_vm0, %v2984_v39  ;;  %2224 = vmatmul.msk.f32.gmra.mxu3 %vm33_vm0, %v2984_v39 }
 0x107   :  { %v235_v41 = vpop.f32.mrf.mxu0 }
 0x108   :  { %v256_v27 = vadd.f32 %v235_v41, %v63_v14 }
 0x109   :  { %v2995_v18 = vpop.f32.mrf.mxu2  ;;  %v2997_v23 = vpop.f32.mrf.mxu3 }
 0x10a   :  { %4396 = vst [vmem:[#allocation38_spill] sm:$0xff] %v2995_v18  ;;  %v2999_v30 = vpop.f32.mrf.mxu1  ;;  %2177 = vmatmul.msk.f32.gmra.mxu0 %vm33_vm0, %v3004_v36  ;;  %v3196_v18 = vld [vmem:[%s4352_s2 + $0x68] sm:$0xff] }
 0x10b   :  { %4397 = vst [vmem:[#allocation39_spill] sm:$0xff] %v2997_v23 }
 0x10c   :  { %4398 = vst [vmem:[#allocation40_spill] sm:$0xff] %v2999_v30 }
 0x10d   :  { %273 = vst.msk [vmem:[#allocation2 + $0x68] sm:$0xff] %vm33_vm0, %v256_v27  ;;  %2193 = vmatmul.msk.f32.gmra.mxu1 %vm33_vm0, %v3004_v36  ;;  %v3024_v27 = vld [vmem:[%s4352_s2 + $0x28] sm:$0xff] }
 0x10e   :  { %2209 = vmatmul.msk.f32.gmra.mxu2 %vm33_vm0, %v3004_v36  ;;  %2225 = vmatmul.msk.f32.gmra.mxu3 %vm33_vm0, %v3004_v36 }
 0x10f   :  { %v238_v0 = vpop.f32.mrf.mxu0 }
 0x110   :  { %v257_v14 = vadd.f32 %v238_v0, %v64_v44  ;;  %v65_v44 = vld [vmem:[#allocation2 + $0x78] sm:$0xff] }
 0x111   :  { %v3015_v43 = vpop.f32.mrf.mxu2  ;;  %v3017_v7 = vpop.f32.mrf.mxu3 }
 0x112   :  { %4399 = vst [vmem:[#allocation41_spill] sm:$0xff] %v3015_v43  ;;  %v3019_v41 = vpop.f32.mrf.mxu1  ;;  %2178 = vmatmul.msk.f32.gmra.mxu0 %vm33_vm0, %v3024_v27  ;;  %v3171_v43 = vld [vmem:[%s4352_s2 + $0x60] sm:$0xff] }
 0x113   :  { %4400 = vst [vmem:[#allocation42_spill] sm:$0xff] %v3017_v7 }
 0x114   :  { %4401 = vst [vmem:[#allocation43_spill] sm:$0xff] %v3019_v41  ;;  %v3150_v41 = vld [vmem:[%s4352_s2 + $0x58] sm:$0xff] }
 0x115   :  { %274 = vst.msk [vmem:[#allocation2 + $0x70] sm:$0xff] %vm33_vm0, %v257_v14  ;;  %2194 = vmatmul.msk.f32.gmra.mxu1 %vm33_vm0, %v3024_v27 }
 0x116   :  { %2210 = vmatmul.msk.f32.gmra.mxu2 %vm33_vm0, %v3024_v27  ;;  %2226 = vmatmul.msk.f32.gmra.mxu3 %vm33_vm0, %v3024_v27 }
 0x117   :  { %v240_v16 = vpop.f32.mrf.mxu0 }
 0x118   :  { %v258_v62 = vadd.f32 %v240_v16, %v65_v44 }
 0x119   :  { %v3035_v0 = vpop.f32.mrf.mxu2  ;;  %v3037_v2 = vpop.f32.mrf.mxu3 }
 0x11a   :  { %4402 = vst [vmem:[#allocation44_spill] sm:$0xff] %v3035_v0  ;;  %v3039_v14 = vpop.f32.mrf.mxu1  ;;  %2179 = vmatmul.msk.f32.gmra.mxu0 %vm33_vm0, %v3044_v42  ;;  %v3129_v0 = vld [vmem:[%s4352_s2 + $0x50] sm:$0xff] }
 0x11b   :  { %4403 = vst [vmem:[#allocation45_spill] sm:$0xff] %v3037_v2 }
 0x11c   :  { %4404 = vst [vmem:[#allocation46_spill] sm:$0xff] %v3039_v14  ;;  %v3108_v14 = vld [vmem:[%s4352_s2 + $0x48] sm:$0xff] }
 0x11d   :  { %275 = vst.msk [vmem:[#allocation2 + $0x78] sm:$0xff] %vm33_vm0, %v258_v62  ;;  %2195 = vmatmul.msk.f32.gmra.mxu1 %vm33_vm0, %v3044_v42  ;;  %v3066_v62 = vld [vmem:[%s4352_s2 + $0x38] sm:$0xff] }
 0x11e   :  { %2211 = vmatmul.msk.f32.gmra.mxu2 %vm33_vm0, %v3044_v42  ;;  %2227 = vmatmul.msk.f32.gmra.mxu3 %vm33_vm0, %v3044_v42 }
 0x11f   :  { %v3057_v44 = vpop.f32.mrf.mxu0 }
 0x121   :  { %v3055_v16 = vpop.f32.mrf.mxu2  ;;  %v3059_v31 = vpop.f32.mrf.mxu3 }
 0x122   :  { %4405 = vst [vmem:[#allocation47_spill] sm:$0xff] %v3055_v16  ;;  %v3061_v24 = vpop.f32.mrf.mxu1  ;;  %2180 = vmatmul.msk.f32.gmra.mxu0 %vm33_vm0, %v3066_v62  ;;  %v3087_v16 = vld [vmem:[%s4352_s2 + $0x40] sm:$0xff] }
 0x123   :  { %4406 = vst [vmem:[#allocation48_spill] sm:$0xff] %v3059_v31 }
 0x124   :  { %4407 = vst [vmem:[#allocation49_spill] sm:$0xff] %v3061_v24 }
 0x125   :  { %2196 = vmatmul.msk.f32.gmra.mxu1 %vm33_vm0, %v3066_v62 }
 0x126   :  { %2212 = vmatmul.msk.f32.gmra.mxu2 %vm33_vm0, %v3066_v62  ;;  %2228 = vmatmul.msk.f32.gmra.mxu3 %vm33_vm0, %v3066_v62 }
 0x127   :  { %v3078_v11 = vpop.f32.mrf.mxu0 }
 0x129   :  { %v3076_v17 = vpop.f32.mrf.mxu2  ;;  %v3080_v24 = vpop.f32.mrf.mxu3 }
 0x12a   :  { %4408 = vst [vmem:[#allocation50_spill] sm:$0xff] %v3076_v17  ;;  %v3082_v31 = vpop.f32.mrf.mxu1  ;;  %2181 = vmatmul.msk.f32.gmra.mxu0 %vm33_vm0, %v3087_v16 }
 0x12b   :  { %4409 = vst [vmem:[#allocation51_spill] sm:$0xff] %v3080_v24 }
 0x12c   :  { %4410 = vst [vmem:[#allocation52_spill] sm:$0xff] %v3082_v31 }
 0x12d   :  { %2197 = vmatmul.msk.f32.gmra.mxu1 %vm33_vm0, %v3087_v16 }
 0x12e   :  { %2213 = vmatmul.msk.f32.gmra.mxu2 %vm33_vm0, %v3087_v16  ;;  %2229 = vmatmul.msk.f32.gmra.mxu3 %vm33_vm0, %v3087_v16 }
 0x12f   :  { %v3099_v31 = vpop.f32.mrf.mxu0 }
 0x131   :  { %v3097_v24 = vpop.f32.mrf.mxu2  ;;  %v3101_v17 = vpop.f32.mrf.mxu3 }
 0x132   :  { %4411 = vst [vmem:[#allocation53_spill] sm:$0xff] %v3097_v24  ;;  %v3103_v6 = vpop.f32.mrf.mxu1  ;;  %2182 = vmatmul.msk.f32.gmra.mxu0 %vm33_vm0, %v3108_v14 }
 0x133   :  { %4412 = vst [vmem:[#allocation54_spill] sm:$0xff] %v3101_v17 }
 0x134   :  { %4413 = vst [vmem:[#allocation55_spill] sm:$0xff] %v3103_v6 }
 0x135   :  { %2198 = vmatmul.msk.f32.gmra.mxu1 %vm33_vm0, %v3108_v14 }
 0x136   :  { %2214 = vmatmul.msk.f32.gmra.mxu2 %vm33_vm0, %v3108_v14  ;;  %2230 = vmatmul.msk.f32.gmra.mxu3 %vm33_vm0, %v3108_v14 }
 0x137   :  { %v3120_v6 = vpop.f32.mrf.mxu0 }
 0x139   :  { %v3118_v17 = vpop.f32.mrf.mxu2  ;;  %v3122_v24 = vpop.f32.mrf.mxu3 }
 0x13a   :  { %4414 = vst [vmem:[#allocation56_spill] sm:$0xff] %v3118_v17  ;;  %v3124_v2 = vpop.f32.mrf.mxu1  ;;  %2183 = vmatmul.msk.f32.gmra.mxu0 %vm33_vm0, %v3129_v0 }
 0x13b   :  { %4415 = vst [vmem:[#allocation57_spill] sm:$0xff] %v3122_v24 }
 0x13c   :  { %4416 = vst [vmem:[#allocation58_spill] sm:$0xff] %v3124_v2 }
 0x13d   :  { %2199 = vmatmul.msk.f32.gmra.mxu1 %vm33_vm0, %v3129_v0 }
 0x13e   :  { %2215 = vmatmul.msk.f32.gmra.mxu2 %vm33_vm0, %v3129_v0  ;;  %2231 = vmatmul.msk.f32.gmra.mxu3 %vm33_vm0, %v3129_v0 }
 0x13f   :  { %v3141_v2 = vpop.f32.mrf.mxu0 }
 0x141   :  { %v3139_v24 = vpop.f32.mrf.mxu2  ;;  %v3143_v17 = vpop.f32.mrf.mxu3 }
 0x142   :  { %4417 = vst [vmem:[#allocation59_spill] sm:$0xff] %v3139_v24  ;;  %v3145_v63 = vpop.f32.mrf.mxu1  ;;  %2184 = vmatmul.msk.f32.gmra.mxu0 %vm33_vm0, %v3150_v41 }
 0x143   :  { %4418 = vst [vmem:[#allocation60_spill] sm:$0xff] %v3143_v17 }
 0x144   :  { %4419 = vst [vmem:[#allocation61_spill] sm:$0xff] %v3145_v63 }
 0x145   :  { %2200 = vmatmul.msk.f32.gmra.mxu1 %vm33_vm0, %v3150_v41 }
 0x146   :  { %2216 = vmatmul.msk.f32.gmra.mxu2 %vm33_vm0, %v3150_v41  ;;  %2232 = vmatmul.msk.f32.gmra.mxu3 %vm33_vm0, %v3150_v41 }
 0x147   :  { %v3162_v63 = vpop.f32.mrf.mxu0 }
 0x149   :  { %v3160_v17 = vpop.f32.mrf.mxu2  ;;  %v3164_v24 = vpop.f32.mrf.mxu3 }
 0x14a   :  { %4420 = vst [vmem:[#allocation62_spill] sm:$0xff] %v3160_v17  ;;  %v3166_v7 = vpop.f32.mrf.mxu1  ;;  %2185 = vmatmul.msk.f32.gmra.mxu0 %vm33_vm0, %v3171_v43 }
 0x14b   :  { %4421 = vst [vmem:[#allocation63_spill] sm:$0xff] %v3164_v24  ;;  %v1268_v24 = vld [vmem:[%s4351_s6 + $0x28] sm:$0xff] }
 0x14c   :  { %4422 = vst [vmem:[#allocation64_spill] sm:$0xff] %v3166_v7  ;;  %v1267_v7 = vld [vmem:[%s4351_s6 + $0x20] sm:$0xff]  ;;  %1657 = vmatpush.msra.mxu3 %v1268_v24  ;;  %v1266_v24 = vld [vmem:[%s4351_s6 + $0x18] sm:$0xff] }
 0x14d   :  { %2201 = vmatmul.msk.f32.gmra.mxu1 %vm33_vm0, %v3171_v43  ;;  %1592 = vmatpush.msra.mxu2 %v1267_v7  ;;  %v1265_v7 = vld [vmem:[%s4351_s6 + $0x10] sm:$0xff] }
 0x14e   :  { %2217 = vmatmul.msk.f32.gmra.mxu2 %vm33_vm0, %v3171_v43  ;;  %2233 = vmatmul.msk.f32.gmra.mxu3 %vm33_vm0, %v3171_v43 }
 0x14f   :  { %v582_v58 = vpop.f32.mrf.mxu0  ;;  %1462 = vmatpush.msra.mxu0 %v1265_v7  ;;  %1527 = vmatpush.msra.mxu1 %v1266_v24  ;;  %v3221_v7 = vld [vmem:[%s4352_s2 + $0x70] sm:$0xff] }
 0x151   :  { %v3187_v17 = vpop.f32.mrf.mxu2  ;;  %v3189_v30 = vpop.f32.mrf.mxu3 }
 0x152   :  { %4423 = vst [vmem:[#allocation65_spill] sm:$0xff] %v3187_v17  ;;  %v3191_v23 = vpop.f32.mrf.mxu1  ;;  %2186 = vmatmul.msk.f32.gmra.mxu0 %vm33_vm0, %v3196_v18 }
 0x153   :  { %4424 = vst [vmem:[#allocation66_spill] sm:$0xff] %v3189_v30 }
 0x154   :  { %4425 = vst [vmem:[#allocation67_spill] sm:$0xff] %v3191_v23 }
 0x155   :  { %2202 = vmatmul.msk.f32.gmra.mxu1 %vm33_vm0, %v3196_v18 }
 0x156   :  { %2218 = vmatmul.msk.f32.gmra.mxu2 %vm33_vm0, %v3196_v18  ;;  %2234 = vmatmul.msk.f32.gmra.mxu3 %vm33_vm0, %v3196_v18 }
 0x157   :  { %v585_v30 = vpop.f32.mrf.mxu0 }
 0x159   :  { %v3212_v23 = vpop.f32.mrf.mxu2  ;;  %v3214_v17 = vpop.f32.mrf.mxu3 }
 0x15a   :  { %4426 = vst [vmem:[#allocation68_spill] sm:$0xff] %v3212_v23  ;;  %v3216_v55 = vpop.f32.mrf.mxu1  ;;  %2187 = vmatmul.msk.f32.gmra.mxu0 %vm33_vm0, %v3221_v7 }
 0x15b   :  { %4427 = vst [vmem:[#allocation69_spill] sm:$0xff] %v3214_v17 }
 0x15c   :  { %4428 = vst [vmem:[#allocation70_spill] sm:$0xff] %v3216_v55 }
 0x15d   :  { %2203 = vmatmul.msk.f32.gmra.mxu1 %vm33_vm0, %v3221_v7 }
 0x15e   :  { %2219 = vmatmul.msk.f32.gmra.mxu2 %vm33_vm0, %v3221_v7  ;;  %2235 = vmatmul.msk.f32.gmra.mxu3 %vm33_vm0, %v3221_v7 }
 0x15f   :  { %v588_v55 = vpop.f32.mrf.mxu0 }
 0x161   :  { %v3231_v24 = vpop.f32.mrf.mxu2  ;;  %v3233_v17 = vpop.f32.mrf.mxu3 }
 0x162   :  { %4429 = vst [vmem:[#allocation71_spill] sm:$0xff] %v3231_v24  ;;  %v3235_v23 = vpop.f32.mrf.mxu1  ;;  %2188 = vmatmul.msk.f32.gmra.mxu0 %vm33_vm0, %v3240_v10 }
 0x163   :  { %4430 = vst [vmem:[#allocation72_spill] sm:$0xff] %v3233_v17  ;;  %v343_v17 = vmul.f32 2.0, %v327_v37  ;;  %v344_v37 = vmul.f32 2.0, %v328_v40 }
 0x164   :  { %4431 = vst [vmem:[#allocation73_spill] sm:$0xff] %v3235_v23 }
 0x165   :  { %2204 = vmatmul.msk.f32.gmra.mxu1 %vm33_vm0, %v3240_v10  ;;  %v3261_v32 = vsub.f32 %v343_v17, %v2924_v46 }
 0x166   :  { %2220 = vmatmul.msk.f32.gmra.mxu2 %vm33_vm0, %v3240_v10  ;;  %2236 = vmatmul.msk.f32.gmra.mxu3 %vm33_vm0, %v3240_v10 }
 0x167   :  { %v3252_v24 = vpop.f32.mrf.mxu0 }
 0x169   :  { %v3250_v23 = vpop.f32.mrf.mxu2  ;;  %v3254_v60 = vpop.f32.mrf.mxu3 }
 0x16a   :  { %4432 = vst [vmem:[#allocation74_spill] sm:$0xff] %v3250_v23  ;;  %v3256_v51 = vpop.f32.mrf.mxu1  ;;  %2237 = vmatmul.msk.f32.vlgmr.msrb.gmra.mxu0 %vm33_vm0, %v2924_v46 }
 0x16b   :  { %4433 = vst [vmem:[#allocation75_spill] sm:$0xff] %v3254_v60 }
 0x16d   :  { %2253 = vmatmul.msk.f32.vlgmr.msrb.gmra.mxu1 %vm33_vm0, %v2924_v46  ;;  %v3280_v46 = vsub.f32 %v344_v37, %v2944_v33 }
 0x16e   :  { %2269 = vmatmul.msk.f32.vlgmr.msrb.gmra.mxu2 %vm33_vm0, %v3261_v32  ;;  %2285 = vmatmul.msk.f32.vlgmr.msrb.gmra.mxu3 %vm33_vm0, %v3261_v32 }
 0x16f   :  { %v3269_v23 = vpop.f32.mrf.mxu0 }
 0x171   :  { %v1020_v60 = vpop.f32.mrf.mxu2  ;;  %v3273_v29 = vpop.f32.mrf.mxu3 }
 0x172   :  { %v3271_v35 = vadd.f32 %v1020_v60, %v582_v58  ;;  %4435 = vst [vmem:[#allocation77_spill] sm:$0xff] %v3273_v29  ;;  %v3275_v17 = vpop.f32.mrf.mxu1  ;;  %2238 = vmatmul.msk.f32.gmra.mxu0 %vm33_vm0, %v2944_v33  ;;  %v345_v58 = vmul.f32 2.0, %v329_v25  ;;  %v330_v29 = vld [vmem:[#allocation2 + $0x18] sm:$0xff] }
 0x173   :  { %v346_v25 = vmul.f32 2.0, %v330_v29 }
 0x174   :  { %4434 = vst [vmem:[#allocation76_spill] sm:$0xff] %v3271_v35 }
 0x175   :  { %2254 = vmatmul.msk.f32.gmra.mxu1 %vm33_vm0, %v2944_v33  ;;  %v3299_v33 = vsub.f32 %v345_v58, %v2964_v49 }
 0x176   :  { %2270 = vmatmul.msk.f32.gmra.mxu2 %vm33_vm0, %v3280_v46  ;;  %2286 = vmatmul.msk.f32.gmra.mxu3 %vm33_vm0, %v3280_v46 }
 0x177   :  { %v3288_v60 = vpop.f32.mrf.mxu0 }
 0x179   :  { %v1023_v40 = vpop.f32.mrf.mxu2  ;;  %v3292_v35 = vpop.f32.mrf.mxu3 }
 0x17a   :  { %v3290_v21 = vadd.f32 %v1023_v40, %v585_v30  ;;  %4437 = vst [vmem:[#allocation79_spill] sm:$0xff] %v3292_v35  ;;  %v3294_v37 = vpop.f32.mrf.mxu1  ;;  %2239 = vmatmul.msk.f32.gmra.mxu0 %vm33_vm0, %v2964_v49 }
 0x17c   :  { %4436 = vst [vmem:[#allocation78_spill] sm:$0xff] %v3290_v21 }
 0x17d   :  { %2255 = vmatmul.msk.f32.gmra.mxu1 %vm33_vm0, %v2964_v49  ;;  %v3318_v49 = vsub.f32 %v346_v25, %v2984_v39  ;;  %v332_v25 = vld [vmem:[#allocation2 + $0x28] sm:$0xff] }
 0x17e   :  { %2271 = vmatmul.msk.f32.gmra.mxu2 %vm33_vm0, %v3299_v33  ;;  %2287 = vmatmul.msk.f32.gmra.mxu3 %vm33_vm0, %v3299_v33 }
 0x17f   :  { %v3307_v40 = vpop.f32.mrf.mxu0 }
 0x181   :  { %v1026_v30 = vpop.f32.mrf.mxu2  ;;  %v3311_v35 = vpop.f32.mrf.mxu3 }
 0x182   :  { %v3309_v21 = vadd.f32 %v1026_v30, %v588_v55  ;;  %4439 = vst [vmem:[#allocation81_spill] sm:$0xff] %v3311_v35  ;;  %v3313_v58 = vpop.f32.mrf.mxu1  ;;  %2240 = vmatmul.msk.f32.gmra.mxu0 %vm33_vm0, %v2984_v39  ;;  %v347_v55 = vmul.f32 2.0, %v331_v20  ;;  %v348_v20 = vmul.f32 2.0, %v332_v25 }
 0x184   :  { %4438 = vst [vmem:[#allocation80_spill] sm:$0xff] %v3309_v21 }
 0x185   :  { %2256 = vmatmul.msk.f32.gmra.mxu1 %vm33_vm0, %v2984_v39  ;;  %v3337_v39 = vsub.f32 %v347_v55, %v3004_v36  ;;  %v333_v55 = vld [vmem:[#allocation2 + $0x30] sm:$0xff] }
 0x186   :  { %2272 = vmatmul.msk.f32.gmra.mxu2 %vm33_vm0, %v3318_v49  ;;  %2288 = vmatmul.msk.f32.gmra.mxu3 %vm33_vm0, %v3318_v49  ;;  %v349_v25 = vmul.f32 2.0, %v333_v55 }
 0x187   :  { %v3328_v30 = vpop.f32.mrf.mxu0 }
 0x189   :  { %v3326_v29 = vpop.f32.mrf.mxu2  ;;  %v3330_v21 = vpop.f32.mrf.mxu3 }
 0x18a   :  { %4440 = vst [vmem:[#allocation82_spill] sm:$0xff] %v3326_v29  ;;  %v3332_v35 = vpop.f32.mrf.mxu1  ;;  %2241 = vmatmul.msk.f32.gmra.mxu0 %vm33_vm0, %v3004_v36 }
 0x18b   :  { %4441 = vst [vmem:[#allocation83_spill] sm:$0xff] %v3330_v21 }
 0x18d   :  { %2257 = vmatmul.msk.f32.gmra.mxu1 %vm33_vm0, %v3004_v36  ;;  %v3356_v36 = vsub.f32 %v348_v20, %v3024_v27  ;;  %v334_v20 = vld [vmem:[#allocation2 + $0x38] sm:$0xff] }
 0x18e   :  { %2273 = vmatmul.msk.f32.gmra.mxu2 %vm33_vm0, %v3337_v39  ;;  %2289 = vmatmul.msk.f32.gmra.mxu3 %vm33_vm0, %v3337_v39  ;;  %v350_v55 = vmul.f32 2.0, %v334_v20 }
 0x18f   :  { %v3347_v29 = vpop.f32.mrf.mxu0 }
 0x191   :  { %v3345_v21 = vpop.f32.mrf.mxu2  ;;  %v3349_v45 = vpop.f32.mrf.mxu3 }
 0x192   :  { %4442 = vst [vmem:[#allocation84_spill] sm:$0xff] %v3345_v21  ;;  %v3351_v12 = vpop.f32.mrf.mxu1  ;;  %2242 = vmatmul.msk.f32.gmra.mxu0 %vm33_vm0, %v3024_v27 }
 0x193   :  { %4443 = vst [vmem:[#allocation85_spill] sm:$0xff] %v3349_v45 }
 0x195   :  { %2258 = vmatmul.msk.f32.gmra.mxu1 %vm33_vm0, %v3024_v27  ;;  %v3375_v27 = vsub.f32 %v349_v25, %v3044_v42  ;;  %v335_v25 = vld [vmem:[#allocation2 + $0x40] sm:$0xff] }
 0x196   :  { %2274 = vmatmul.msk.f32.gmra.mxu2 %vm33_vm0, %v3356_v36  ;;  %2290 = vmatmul.msk.f32.gmra.mxu3 %vm33_vm0, %v3356_v36  ;;  %v351_v20 = vmul.f32 2.0, %v335_v25 }
 0x197   :  { %v3366_v21 = vpop.f32.mrf.mxu0 }
 0x199   :  { %v3364_v45 = vpop.f32.mrf.mxu2  ;;  %v3368_v5 = vpop.f32.mrf.mxu3 }
 0x19a   :  { %4444 = vst [vmem:[#allocation86_spill] sm:$0xff] %v3364_v45  ;;  %v3370_v3 = vpop.f32.mrf.mxu1  ;;  %2243 = vmatmul.msk.f32.gmra.mxu0 %vm33_vm0, %v3044_v42 }
 0x19b   :  { %4445 = vst [vmem:[#allocation87_spill] sm:$0xff] %v3368_v5 }
 0x19d   :  { %2259 = vmatmul.msk.f32.gmra.mxu1 %vm33_vm0, %v3044_v42  ;;  %v3394_v42 = vsub.f32 %v350_v55, %v3066_v62  ;;  %v336_v55 = vld [vmem:[#allocation2 + $0x48] sm:$0xff] }
 0x19e   :  { %2275 = vmatmul.msk.f32.gmra.mxu2 %vm33_vm0, %v3375_v27  ;;  %2291 = vmatmul.msk.f32.gmra.mxu3 %vm33_vm0, %v3375_v27  ;;  %v352_v25 = vmul.f32 2.0, %v336_v55 }
 0x19f   :  { %v3385_v45 = vpop.f32.mrf.mxu0 }
 0x1a1   :  { %v3383_v5 = vpop.f32.mrf.mxu2  ;;  %v3387_v53 = vpop.f32.mrf.mxu3 }
 0x1a2   :  { %4446 = vst [vmem:[#allocation88_spill] sm:$0xff] %v3383_v5  ;;  %v3389_v47 = vpop.f32.mrf.mxu1  ;;  %2244 = vmatmul.msk.f32.gmra.mxu0 %vm33_vm0, %v3066_v62 }
 0x1a3   :  { %4447 = vst [vmem:[#allocation89_spill] sm:$0xff] %v3387_v53 }
 0x1a5   :  { %2260 = vmatmul.msk.f32.gmra.mxu1 %vm33_vm0, %v3066_v62  ;;  %v3413_v62 = vsub.f32 %v351_v20, %v3087_v16  ;;  %v337_v20 = vld [vmem:[#allocation2 + $0x50] sm:$0xff] }
 0x1a6   :  { %2276 = vmatmul.msk.f32.gmra.mxu2 %vm33_vm0, %v3394_v42  ;;  %2292 = vmatmul.msk.f32.gmra.mxu3 %vm33_vm0, %v3394_v42  ;;  %v353_v55 = vmul.f32 2.0, %v337_v20 }
 0x1a7   :  { %v3404_v5 = vpop.f32.mrf.mxu0 }
 0x1a9   :  { %v3402_v53 = vpop.f32.mrf.mxu2  ;;  %v3406_v38 = vpop.f32.mrf.mxu3 }
 0x1aa   :  { %4448 = vst [vmem:[#allocation90_spill] sm:$0xff] %v3402_v53  ;;  %v3408_v34 = vpop.f32.mrf.mxu1  ;;  %2245 = vmatmul.msk.f32.gmra.mxu0 %vm33_vm0, %v3087_v16 }
 0x1ab   :  { %4449 = vst [vmem:[#allocation91_spill] sm:$0xff] %v3406_v38 }
 0x1ad   :  { %2261 = vmatmul.msk.f32.gmra.mxu1 %vm33_vm0, %v3087_v16  ;;  %v3432_v16 = vsub.f32 %v352_v25, %v3108_v14  ;;  %v338_v25 = vld [vmem:[#allocation2 + $0x58] sm:$0xff] }
 0x1ae   :  { %2277 = vmatmul.msk.f32.gmra.mxu2 %vm33_vm0, %v3413_v62  ;;  %2293 = vmatmul.msk.f32.gmra.mxu3 %vm33_vm0, %v3413_v62  ;;  %v354_v20 = vmul.f32 2.0, %v338_v25 }
 0x1af   :  { %v3423_v53 = vpop.f32.mrf.mxu0 }
 0x1b1   :  { %v3421_v38 = vpop.f32.mrf.mxu2  ;;  %v3425_v28 = vpop.f32.mrf.mxu3 }
 0x1b2   :  { %4450 = vst [vmem:[#allocation92_spill] sm:$0xff] %v3421_v38  ;;  %v3427_v26 = vpop.f32.mrf.mxu1  ;;  %2246 = vmatmul.msk.f32.gmra.mxu0 %vm33_vm0, %v3108_v14 }
 0x1b3   :  { %4451 = vst [vmem:[#allocation93_spill] sm:$0xff] %v3425_v28 }
 0x1b5   :  { %2262 = vmatmul.msk.f32.gmra.mxu1 %vm33_vm0, %v3108_v14  ;;  %v3451_v14 = vsub.f32 %v353_v55, %v3129_v0  ;;  %v339_v55 = vld [vmem:[#allocation2 + $0x60] sm:$0xff] }
 0x1b6   :  { %2278 = vmatmul.msk.f32.gmra.mxu2 %vm33_vm0, %v3432_v16  ;;  %2294 = vmatmul.msk.f32.gmra.mxu3 %vm33_vm0, %v3432_v16  ;;  %v355_v25 = vmul.f32 2.0, %v339_v55 }
 0x1b7   :  { %v3442_v38 = vpop.f32.mrf.mxu0 }
 0x1b8   :  { %4453 = vst [vmem:[#allocation95_spill] sm:$0xff] %v3442_v38 }
 0x1b9   :  { %v3440_v28 = vpop.f32.mrf.mxu2  ;;  %v3444_v22 = vpop.f32.mrf.mxu3 }
 0x1ba   :  { %4452 = vst [vmem:[#allocation94_spill] sm:$0xff] %v3440_v28  ;;  %v3446_v19 = vpop.f32.mrf.mxu1  ;;  %2247 = vmatmul.msk.f32.gmra.mxu0 %vm33_vm0, %v3129_v0 }
 0x1bb   :  { %4454 = vst [vmem:[#allocation96_spill] sm:$0xff] %v3444_v22 }
 0x1bc   :  { %4455 = vst [vmem:[#allocation97_spill] sm:$0xff] %v3446_v19 }
 0x1bd   :  { %2263 = vmatmul.msk.f32.gmra.mxu1 %vm33_vm0, %v3129_v0  ;;  %v3470_v0 = vsub.f32 %v354_v20, %v3150_v41  ;;  %v340_v20 = vld [vmem:[#allocation2 + $0x68] sm:$0xff] }
 0x1be   :  { %2279 = vmatmul.msk.f32.gmra.mxu2 %vm33_vm0, %v3451_v14  ;;  %2295 = vmatmul.msk.f32.gmra.mxu3 %vm33_vm0, %v3451_v14  ;;  %v356_v55 = vmul.f32 2.0, %v340_v20 }
 0x1bf   :  { %v3461_v28 = vpop.f32.mrf.mxu0 }
 0x1c0   :  { %4457 = vst [vmem:[#allocation99_spill] sm:$0xff] %v3461_v28 }
 0x1c1   :  { %v3459_v22 = vpop.f32.mrf.mxu2  ;;  %v3463_v19 = vpop.f32.mrf.mxu3 }
 0x1c2   :  { %4456 = vst [vmem:[#allocation98_spill] sm:$0xff] %v3459_v22  ;;  %v3465_v38 = vpop.f32.mrf.mxu1  ;;  %2248 = vmatmul.msk.f32.gmra.mxu0 %vm33_vm0, %v3150_v41 }
 0x1c3   :  { %4458 = vst [vmem:[#allocation100_spill] sm:$0xff] %v3463_v19 }
 0x1c4   :  { %4459 = vst [vmem:[#allocation101_spill] sm:$0xff] %v3465_v38 }
 0x1c5   :  { %2264 = vmatmul.msk.f32.gmra.mxu1 %vm33_vm0, %v3150_v41  ;;  %v3489_v41 = vsub.f32 %v355_v25, %v3171_v43  ;;  %v341_v25 = vld [vmem:[#allocation2 + $0x70] sm:$0xff] }
 0x1c6   :  { %2280 = vmatmul.msk.f32.gmra.mxu2 %vm33_vm0, %v3470_v0  ;;  %2296 = vmatmul.msk.f32.gmra.mxu3 %vm33_vm0, %v3470_v0  ;;  %v357_v20 = vmul.f32 2.0, %v341_v25 }
 0x1c7   :  { %v3480_v22 = vpop.f32.mrf.mxu0 }
 0x1c8   :  { %4461 = vst [vmem:[#allocation103_spill] sm:$0xff] %v3480_v22 }
 0x1c9   :  { %v3478_v19 = vpop.f32.mrf.mxu2  ;;  %v3482_v38 = vpop.f32.mrf.mxu3 }
 0x1ca   :  { %4460 = vst [vmem:[#allocation102_spill] sm:$0xff] %v3478_v19  ;;  %v3484_v28 = vpop.f32.mrf.mxu1  ;;  %2249 = vmatmul.msk.f32.gmra.mxu0 %vm33_vm0, %v3171_v43 }
 0x1cb   :  { %4462 = vst [vmem:[#allocation104_spill] sm:$0xff] %v3482_v38 }
 0x1cc   :  { %4463 = vst [vmem:[#allocation105_spill] sm:$0xff] %v3484_v28 }
 0x1cd   :  { %2265 = vmatmul.msk.f32.gmra.mxu1 %vm33_vm0, %v3171_v43  ;;  %v3508_v43 = vsub.f32 %v356_v55, %v3196_v18  ;;  %v342_v55 = vld [vmem:[#allocation2 + $0x78] sm:$0xff] }
 0x1ce   :  { %2281 = vmatmul.msk.f32.gmra.mxu2 %vm33_vm0, %v3489_v41  ;;  %2297 = vmatmul.msk.f32.gmra.mxu3 %vm33_vm0, %v3489_v41  ;;  %v358_v25 = vmul.f32 2.0, %v342_v55 }
 0x1cf   :  { %v3499_v19 = vpop.f32.mrf.mxu0  ;;  %4468 = vst [vmem:[#allocation110_spill] sm:$0xff] %v3508_v43 }
 0x1d0   :  { %4465 = vst [vmem:[#allocation107_spill] sm:$0xff] %v3499_v19 }
 0x1d1   :  { %v3497_v38 = vpop.f32.mrf.mxu2  ;;  %v3501_v28 = vpop.f32.mrf.mxu3 }
 0x1d2   :  { %4464 = vst [vmem:[#allocation106_spill] sm:$0xff] %v3497_v38  ;;  %v3503_v22 = vpop.f32.mrf.mxu1  ;;  %2250 = vmatmul.msk.f32.gmra.mxu0 %vm33_vm0, %v3196_v18 }
 0x1d3   :  { %4466 = vst [vmem:[#allocation108_spill] sm:$0xff] %v3501_v28 }
 0x1d4   :  { %4467 = vst [vmem:[#allocation109_spill] sm:$0xff] %v3503_v22 }
 0x1d5   :  { %2266 = vmatmul.msk.f32.gmra.mxu1 %vm33_vm0, %v3196_v18  ;;  %v3527_v18 = vsub.f32 %v357_v20, %v3221_v7 }
 0x1d6   :  { %2282 = vmatmul.msk.f32.gmra.mxu2 %vm33_vm0, %v3508_v43  ;;  %2298 = vmatmul.msk.f32.gmra.mxu3 %vm33_vm0, %v3508_v43 }
 0x1d7   :  { %v3518_v38 = vpop.f32.mrf.mxu0  ;;  %4473 = vst [vmem:[#allocation115_spill] sm:$0xff] %v3527_v18 }
 0x1d8   :  { %4470 = vst [vmem:[#allocation112_spill] sm:$0xff] %v3518_v38 }
 0x1d9   :  { %v3516_v28 = vpop.f32.mrf.mxu2  ;;  %v3520_v22 = vpop.f32.mrf.mxu3 }
 0x1da   :  { %4469 = vst [vmem:[#allocation111_spill] sm:$0xff] %v3516_v28  ;;  %v3522_v19 = vpop.f32.mrf.mxu1  ;;  %2251 = vmatmul.msk.f32.gmra.mxu0 %vm33_vm0, %v3221_v7 }
 0x1db   :  { %4471 = vst [vmem:[#allocation113_spill] sm:$0xff] %v3520_v22 }
 0x1dc   :  { %4472 = vst [vmem:[#allocation114_spill] sm:$0xff] %v3522_v19 }
 0x1dd   :  { %2267 = vmatmul.msk.f32.gmra.mxu1 %vm33_vm0, %v3221_v7  ;;  %v3546_v7 = vsub.f32 %v358_v25, %v3240_v10  ;;  %v891_v25 = vadd.f32 %v3252_v24, %v3057_v44 }
 0x1de   :  { %2283 = vmatmul.msk.f32.gmra.mxu2 %vm33_vm0, %v3527_v18  ;;  %2299 = vmatmul.msk.f32.gmra.mxu3 %vm33_vm0, %v3527_v18 }
 0x1df   :  { %v3537_v28 = vpop.f32.mrf.mxu0  ;;  %4478 = vst [vmem:[#allocation120_spill] sm:$0xff] %v3546_v7 }
 0x1e0   :  { %4475 = vst [vmem:[#allocation117_spill] sm:$0xff] %v3537_v28 }
 0x1e1   :  { %v3535_v22 = vpop.f32.mrf.mxu2  ;;  %v3539_v19 = vpop.f32.mrf.mxu3 }
 0x1e2   :  { %4474 = vst [vmem:[#allocation116_spill] sm:$0xff] %v3535_v22  ;;  %v3541_v38 = vpop.f32.mrf.mxu1  ;;  %2252 = vmatmul.msk.f32.gmra.mxu0 %vm33_vm0, %v3240_v10 }
 0x1e3   :  { %4476 = vst [vmem:[#allocation118_spill] sm:$0xff] %v3539_v19 }
 0x1e4   :  { %4477 = vst [vmem:[#allocation119_spill] sm:$0xff] %v3541_v38 }
 0x1e5   :  { %2268 = vmatmul.msk.f32.gmra.mxu1 %vm33_vm0, %v3240_v10  ;;  %v3567_v10 = vld [vmem:[%s4353_s7] sm:$0x3f] }
 0x1e6   :  { %2284 = vmatmul.msk.f32.gmra.mxu2 %vm33_vm0, %v3546_v7  ;;  %2300 = vmatmul.msk.f32.gmra.mxu3 %vm33_vm0, %v3546_v7 }
 0x1e7   :  { %v3556_v55 = vpop.f32.mrf.mxu0 }
 0x1e8   :  { %4480 = vst [vmem:[#allocation122_spill] sm:$0xff] %v3556_v55  ;;  %v3583_v55 = vperm.slane %v3567_v10, 1 }
 0x1e9   :  { %v3554_v20 = vpop.f32.mrf.mxu2  ;;  %v3558_v19 = vpop.f32.mrf.mxu3 }
 0x1ea   :  { %4479 = vst [vmem:[#allocation121_spill] sm:$0xff] %v3554_v20  ;;  %v3560_v22 = vpop.f32.mrf.mxu1  ;;  %2301 = vmatmul.msk.f32.vlgmr.msra.gmra.mxu0 %vm33_vm0, %v3261_v32  ;;  %v956_v20 = vadd.f32 %v3256_v51, %v3120_v6  ;;  %v894_v51 = vadd.f32 %v3269_v23, %v3078_v11  ;;  %v959_v6 = vadd.f32 %v3275_v17, %v3141_v2 }
 0x1eb   :  { %4481 = vst [vmem:[#allocation123_spill] sm:$0xff] %v3558_v19  ;;  %v3578_v19 = vperm.slane %v3567_v10, 0  ;;  %v897_v11 = vadd.f32 %v3288_v60, %v3099_v31  ;;  %v962_v2 = vadd.f32 %v3294_v37, %v3162_v63  ;;  %v900_v63 = vadd.f32 %v3307_v40, %v2701_v48 }
 0x1ec   :  { %4482 = vst [vmem:[#allocation124_spill] sm:$0xff] %v3560_v22  ;;  %v965_v31 = vadd.f32 %v3313_v58, %v2715_v50  ;;  %v903_v48 = vadd.f32 %v3328_v30, %v2721_v52  ;;  %v968_v50 = vadd.f32 %v3332_v35, %v2738_v54  ;;  %v906_v52 = vadd.f32 %v3347_v29, %v2744_v56 }
 0x1ed   :  { %2317 = vmatmul.msk.f32.vlgmr.msra.gmra.mxu1 %vm33_vm0, %v3261_v32  ;;  %v971_v54 = vadd.f32 %v3351_v12, %v2752_v57  ;;  %v909_v56 = vadd.f32 %v3366_v21, %v2756_v59  ;;  %v974_v57 = vadd.f32 %v3370_v3, %v2764_v61  ;;  %v912_v59 = vadd.f32 %v3385_v45, %v2768_v1 }
 0x1ee   :  { %2333 = vmatmul.msk.f32.vlgmr.msra.gmra.mxu2 %vm33_vm0, %v3261_v32  ;;  %2349 = vmatmul.msk.f32.vlgmr.msra.gmra.mxu3 %vm33_vm0, %v3261_v32  ;;  %v977_v61 = vadd.f32 %v3389_v47, %v2780_v4  ;;  %v915_v1 = vadd.f32 %v3404_v5, %v2784_v8  ;;  %v980_v4 = vadd.f32 %v3408_v34, %v2795_v9 }
 0x1ef   :  { %v3585_v38 = vpop.f32.mrf.mxu0  ;;  %v918_v8 = vadd.f32 %v3423_v53, %v2799_v13  ;;  %v983_v9 = vadd.f32 %v3427_v26, %v2810_v15  ;;  %v4483_v13 = vld [vmem:[#allocation10_spill] sm:$0xff]  ;;  %v4484_v15 = vld [vmem:[#allocation95_spill] sm:$0xff] }
 0x1f0   :  { %v921_v26 = vadd.f32 %v4484_v15, %v4483_v13  ;;  %v4485_v53 = vld [vmem:[#allocation11_spill] sm:$0xff]  ;;  %v4495_v15 = vld [vmem:[#allocation110_spill] sm:$0xff] }
 0x1f1   :  { %v1334_v22 = vpop.f32.mrf.mxu2  ;;  %v1399_v7 = vpop.f32.mrf.mxu3 }
 0x1f2   :  { %v1707_v28 = vadd.f32 %v1334_v22, %v891_v25  ;;  %v1708_v18 = vadd.f32 %v1399_v7, %v956_v20  ;;  %v3587_v43 = vpop.f32.mrf.mxu1  ;;  %2302 = vmatmul.msk.f32.gmra.mxu0 %vm33_vm0, %v3280_v46 }
 0x1f4   :  { %v1817_v32 = vadd.f32 %v3578_v19, %v1707_v28  ;;  %v1818_v44 = vadd.f32 %v3583_v55, %v1708_v18 }
 0x1f5   :  { %2318 = vmatmul.msk.f32.gmra.mxu1 %vm33_vm0, %v3280_v46 }
 0x1f6   :  { %1913 = vst [vmem:[%s4354_s8] sm:$0xff] %v1817_v32  ;;  %2334 = vmatmul.msk.f32.gmra.mxu2 %vm33_vm0, %v3280_v46  ;;  %2350 = vmatmul.msk.f32.gmra.mxu3 %vm33_vm0, %v3280_v46 }
 0x1f7   :  { %1914 = vst [vmem:[%s4354_s8 + $0x8] sm:$0xff] %v1818_v44  ;;  %v3609_v28 = vpop.f32.mrf.mxu0 }
 0x1f9   :  { %v1337_v22 = vpop.f32.mrf.mxu2  ;;  %v1402_v18 = vpop.f32.mrf.mxu3 }
 0x1fa   :  { %v1713_v24 = vadd.f32 %v1337_v22, %v894_v51  ;;  %v1714_v7 = vadd.f32 %v1402_v18, %v959_v6  ;;  %v3611_v20 = vpop.f32.mrf.mxu1  ;;  %2303 = vmatmul.msk.f32.gmra.mxu0 %vm33_vm0, %v3299_v33 }
 0x1fc   :  { %v1823_v25 = vadd.f32 %v3578_v19, %v1713_v24  ;;  %v1824_v46 = vadd.f32 %v3583_v55, %v1714_v7 }
 0x1fd   :  { %2319 = vmatmul.msk.f32.gmra.mxu1 %vm33_vm0, %v3299_v33 }
 0x1fe   :  { %1919 = vst [vmem:[%s4354_s8 + $0x30] sm:$0xff] %v1823_v25  ;;  %2335 = vmatmul.msk.f32.gmra.mxu2 %vm33_vm0, %v3299_v33  ;;  %2351 = vmatmul.msk.f32.gmra.mxu3 %vm33_vm0, %v3299_v33 }
 0x1ff   :  { %1920 = vst [vmem:[%s4354_s8 + $0x38] sm:$0xff] %v1824_v46  ;;  %v3633_v17 = vpop.f32.mrf.mxu0 }
 0x201   :  { %v1340_v23 = vpop.f32.mrf.mxu2  ;;  %v1405_v44 = vpop.f32.mrf.mxu3 }
 0x202   :  { %v1719_v32 = vadd.f32 %v1340_v23, %v897_v11  ;;  %v1720_v51 = vadd.f32 %v1405_v44, %v962_v2  ;;  %v3635_v6 = vpop.f32.mrf.mxu1  ;;  %2304 = vmatmul.msk.f32.gmra.mxu0 %vm33_vm0, %v3318_v49 }
 0x204   :  { %v1829_v22 = vadd.f32 %v3578_v19, %v1719_v32  ;;  %v1830_v33 = vadd.f32 %v3583_v55, %v1720_v51 }
 0x205   :  { %2320 = vmatmul.msk.f32.gmra.mxu1 %vm33_vm0, %v3318_v49 }
 0x206   :  { %1925 = vst [vmem:[%s4354_s8 + $0x60] sm:$0xff] %v1829_v22  ;;  %2336 = vmatmul.msk.f32.gmra.mxu2 %vm33_vm0, %v3318_v49  ;;  %2352 = vmatmul.msk.f32.gmra.mxu3 %vm33_vm0, %v3318_v49 }
 0x207   :  { %1926 = vst [vmem:[%s4354_s8 + $0x68] sm:$0xff] %v1830_v33  ;;  %v3657_v37 = vpop.f32.mrf.mxu0 }
 0x209   :  { %v1343_v60 = vpop.f32.mrf.mxu2  ;;  %v1408_v18 = vpop.f32.mrf.mxu3 }
 0x20a   :  { %v1725_v24 = vadd.f32 %v1343_v60, %v900_v63  ;;  %v1726_v7 = vadd.f32 %v1408_v18, %v965_v31  ;;  %v3659_v25 = vpop.f32.mrf.mxu1  ;;  %2305 = vmatmul.msk.f32.gmra.mxu0 %vm33_vm0, %v3337_v39 }
 0x20c   :  { %v1835_v46 = vadd.f32 %v3578_v19, %v1725_v24  ;;  %v1836_v49 = vadd.f32 %v3583_v55, %v1726_v7 }
 0x20d   :  { %2321 = vmatmul.msk.f32.gmra.mxu1 %vm33_vm0, %v3337_v39 }
 0x20e   :  { %1931 = vst [vmem:[%s4354_s8 + $0x90] sm:$0xff] %v1835_v46  ;;  %2337 = vmatmul.msk.f32.gmra.mxu2 %vm33_vm0, %v3337_v39  ;;  %2353 = vmatmul.msk.f32.gmra.mxu3 %vm33_vm0, %v3337_v39 }
 0x20f   :  { %1932 = vst [vmem:[%s4354_s8 + $0x98] sm:$0xff] %v1836_v49  ;;  %v3681_v58 = vpop.f32.mrf.mxu0 }
 0x211   :  { %v1346_v40 = vpop.f32.mrf.mxu2  ;;  %v1411_v2 = vpop.f32.mrf.mxu3 }
 0x212   :  { %v1731_v11 = vadd.f32 %v1346_v40, %v903_v48  ;;  %v1732_v23 = vadd.f32 %v1411_v2, %v968_v50  ;;  %v3683_v32 = vpop.f32.mrf.mxu1  ;;  %2306 = vmatmul.msk.f32.gmra.mxu0 %vm33_vm0, %v3356_v36 }
 0x214   :  { %v1841_v44 = vadd.f32 %v3578_v19, %v1731_v11  ;;  %v1842_v39 = vadd.f32 %v3583_v55, %v1732_v23 }
 0x215   :  { %2322 = vmatmul.msk.f32.gmra.mxu1 %vm33_vm0, %v3356_v36 }
 0x216   :  { %1937 = vst [vmem:[%s4354_s8 + $0xc0] sm:$0xff] %v1841_v44  ;;  %2338 = vmatmul.msk.f32.gmra.mxu2 %vm33_vm0, %v3356_v36  ;;  %2354 = vmatmul.msk.f32.gmra.mxu3 %vm33_vm0, %v3356_v36 }
 0x217   :  { %1938 = vst [vmem:[%s4354_s8 + $0xc8] sm:$0xff] %v1842_v39  ;;  %v3705_v30 = vpop.f32.mrf.mxu0 }
 0x219   :  { %v1349_v35 = vpop.f32.mrf.mxu2  ;;  %v1414_v22 = vpop.f32.mrf.mxu3 }
 0x21a   :  { %v1737_v51 = vadd.f32 %v1349_v35, %v906_v52  ;;  %v1738_v33 = vadd.f32 %v1414_v22, %v971_v54  ;;  %v3707_v63 = vpop.f32.mrf.mxu1  ;;  %2307 = vmatmul.msk.f32.gmra.mxu0 %vm33_vm0, %v3375_v27 }
 0x21c   :  { %v1847_v31 = vadd.f32 %v3578_v19, %v1737_v51  ;;  %v1848_v36 = vadd.f32 %v3583_v55, %v1738_v33 }
 0x21d   :  { %2323 = vmatmul.msk.f32.gmra.mxu1 %vm33_vm0, %v3375_v27 }
 0x21e   :  { %1943 = vst [vmem:[%s4354_s8 + $0xf0] sm:$0xff] %v1847_v31  ;;  %2339 = vmatmul.msk.f32.gmra.mxu2 %vm33_vm0, %v3375_v27  ;;  %2355 = vmatmul.msk.f32.gmra.mxu3 %vm33_vm0, %v3375_v27  ;;  %v4486_v31 = vld [vmem:[#allocation97_spill] sm:$0xff] }
 0x21f   :  { %1944 = vst [vmem:[%s4354_s8 + $0xf8] sm:$0xff] %v1848_v36  ;;  %v3729_v29 = vpop.f32.mrf.mxu0  ;;  %v986_v36 = vadd.f32 %v4486_v31, %v4485_v53  ;;  %v4497_v53 = vld [vmem:[#allocation107_spill] sm:$0xff] }
 0x221   :  { %v1352_v12 = vpop.f32.mrf.mxu2  ;;  %v1417_v24 = vpop.f32.mrf.mxu3 }
 0x222   :  { %v1743_v60 = vadd.f32 %v1352_v12, %v909_v56  ;;  %v1744_v18 = vadd.f32 %v1417_v24, %v974_v57  ;;  %v3731_v7 = vpop.f32.mrf.mxu1  ;;  %2308 = vmatmul.msk.f32.gmra.mxu0 %vm33_vm0, %v3394_v42 }
 0x224   :  { %v1853_v46 = vadd.f32 %v3578_v19, %v1743_v60  ;;  %v1854_v27 = vadd.f32 %v3583_v55, %v1744_v18 }
 0x225   :  { %2324 = vmatmul.msk.f32.gmra.mxu1 %vm33_vm0, %v3394_v42 }
 0x226   :  { %1949 = vst [vmem:[%s4354_s8 + $0x120] sm:$0xff] %v1853_v46  ;;  %2340 = vmatmul.msk.f32.gmra.mxu2 %vm33_vm0, %v3394_v42  ;;  %2356 = vmatmul.msk.f32.gmra.mxu3 %vm33_vm0, %v3394_v42 }
 0x227   :  { %1950 = vst [vmem:[%s4354_s8 + $0x128] sm:$0xff] %v1854_v27  ;;  %v3753_v21 = vpop.f32.mrf.mxu0  ;;  %v4487_v27 = vld [vmem:[#allocation13_spill] sm:$0xff] }
 0x229   :  { %v1355_v3 = vpop.f32.mrf.mxu2  ;;  %v1420_v48 = vpop.f32.mrf.mxu3 }
 0x22a   :  { %v1749_v49 = vadd.f32 %v1355_v3, %v912_v59  ;;  %v1750_v50 = vadd.f32 %v1420_v48, %v977_v61  ;;  %v3755_v40 = vpop.f32.mrf.mxu1  ;;  %2309 = vmatmul.msk.f32.gmra.mxu0 %vm33_vm0, %v3413_v62  ;;  %v4488_v59 = vld [vmem:[#allocation99_spill] sm:$0xff]  ;;  %v4489_v3 = vld [vmem:[#allocation14_spill] sm:$0xff] }
 0x22b   :  { %v924_v61 = vadd.f32 %v4488_v59, %v4487_v27 }
 0x22c   :  { %v1859_v11 = vadd.f32 %v3578_v19, %v1749_v49  ;;  %v1860_v42 = vadd.f32 %v3583_v55, %v1750_v50  ;;  %v4490_v49 = vld [vmem:[#allocation101_spill] sm:$0xff] }
 0x22d   :  { %2325 = vmatmul.msk.f32.gmra.mxu1 %vm33_vm0, %v3413_v62  ;;  %v989_v48 = vadd.f32 %v4490_v49, %v4489_v3  ;;  %v4500_v3 = vld [vmem:[#allocation115_spill] sm:$0xff] }
 0x22e   :  { %1955 = vst [vmem:[%s4354_s8 + $0x150] sm:$0xff] %v1859_v11  ;;  %2341 = vmatmul.msk.f32.gmra.mxu2 %vm33_vm0, %v3413_v62  ;;  %2357 = vmatmul.msk.f32.gmra.mxu3 %vm33_vm0, %v3413_v62 }
 0x22f   :  { %1956 = vst [vmem:[%s4354_s8 + $0x158] sm:$0xff] %v1860_v42  ;;  %v3777_v45 = vpop.f32.mrf.mxu0 }
 0x231   :  { %v1358_v47 = vpop.f32.mrf.mxu2  ;;  %v1423_v23 = vpop.f32.mrf.mxu3 }
 0x232   :  { %v1755_v2 = vadd.f32 %v1358_v47, %v915_v1  ;;  %v1756_v44 = vadd.f32 %v1423_v23, %v980_v4  ;;  %v3779_v39 = vpop.f32.mrf.mxu1  ;;  %2310 = vmatmul.msk.f32.gmra.mxu0 %vm33_vm0, %v3432_v16  ;;  %v4491_v23 = vld [vmem:[#allocation16_spill] sm:$0xff] }
 0x234   :  { %v1865_v52 = vadd.f32 %v3578_v19, %v1755_v2  ;;  %v1866_v62 = vadd.f32 %v3583_v55, %v1756_v44  ;;  %v4492_v44 = vld [vmem:[#allocation103_spill] sm:$0xff] }
 0x235   :  { %2326 = vmatmul.msk.f32.gmra.mxu1 %vm33_vm0, %v3432_v16 }
 0x236   :  { %1961 = vst [vmem:[%s4354_s8 + $0x180] sm:$0xff] %v1865_v52  ;;  %2342 = vmatmul.msk.f32.gmra.mxu2 %vm33_vm0, %v3432_v16  ;;  %2358 = vmatmul.msk.f32.gmra.mxu3 %vm33_vm0, %v3432_v16  ;;  %v927_v52 = vadd.f32 %v4492_v44, %v4491_v23 }
 0x237   :  { %1962 = vst [vmem:[%s4354_s8 + $0x188] sm:$0xff] %v1866_v62  ;;  %v3801_v5 = vpop.f32.mrf.mxu0  ;;  %v4493_v62 = vld [vmem:[#allocation17_spill] sm:$0xff] }
 0x239   :  { %v1361_v34 = vpop.f32.mrf.mxu2  ;;  %v1426_v35 = vpop.f32.mrf.mxu3 }
 0x23a   :  { %v1761_v54 = vadd.f32 %v1361_v34, %v918_v8  ;;  %v1762_v51 = vadd.f32 %v1426_v35, %v983_v9  ;;  %v3803_v22 = vpop.f32.mrf.mxu1  ;;  %2311 = vmatmul.msk.f32.gmra.mxu0 %vm33_vm0, %v3451_v14  ;;  %v4494_v8 = vld [vmem:[#allocation105_spill] sm:$0xff] }
 0x23b   :  { %v992_v9 = vadd.f32 %v4494_v8, %v4493_v62 }
 0x23c   :  { %v1871_v33 = vadd.f32 %v3578_v19, %v1761_v54  ;;  %v1872_v16 = vadd.f32 %v3583_v55, %v1762_v51 }
 0x23d   :  { %2327 = vmatmul.msk.f32.gmra.mxu1 %vm33_vm0, %v3451_v14 }
 0x23e   :  { %1967 = vst [vmem:[%s4354_s8 + $0x1b0] sm:$0xff] %v1871_v33  ;;  %2343 = vmatmul.msk.f32.gmra.mxu2 %vm33_vm0, %v3451_v14  ;;  %2359 = vmatmul.msk.f32.gmra.mxu3 %vm33_vm0, %v3451_v14 }
 0x23f   :  { %1968 = vst [vmem:[%s4354_s8 + $0x1b8] sm:$0xff] %v1872_v16  ;;  %v3825_v57 = vpop.f32.mrf.mxu0 }
 0x241   :  { %v1364_v56 = vpop.f32.mrf.mxu2  ;;  %v1429_v60 = vpop.f32.mrf.mxu3 }
 0x242   :  { %v1767_v12 = vadd.f32 %v1364_v56, %v921_v26  ;;  %v1768_v24 = vadd.f32 %v1429_v60, %v986_v36  ;;  %v3827_v18 = vpop.f32.mrf.mxu1  ;;  %2312 = vmatmul.msk.f32.gmra.mxu0 %vm33_vm0, %v3470_v0  ;;  %v4496_v26 = vld [vmem:[#allocation19_spill] sm:$0xff]  ;;  %v4498_v36 = vld [vmem:[#allocation20_spill] sm:$0xff]  ;;  %v4499_v56 = vld [vmem:[#allocation109_spill] sm:$0xff] }
 0x243   :  { %v930_v31 = vadd.f32 %v4497_v53, %v4496_v26  ;;  %v4509_v26 = vld [vmem:[#allocation119_spill] sm:$0xff] }
 0x244   :  { %v1877_v46 = vadd.f32 %v3578_v19, %v1767_v12  ;;  %v1878_v14 = vadd.f32 %v3583_v55, %v1768_v24  ;;  %v995_v12 = vadd.f32 %v4499_v56, %v4498_v36  ;;  %v4510_v56 = vld [vmem:[#allocation28_spill] sm:$0xff] }
 0x245   :  { %2328 = vmatmul.msk.f32.gmra.mxu1 %vm33_vm0, %v3470_v0 }
 0x246   :  { %1973 = vst [vmem:[%s4354_s8 + $0x1e0] sm:$0xff] %v1877_v46  ;;  %2344 = vmatmul.msk.f32.gmra.mxu2 %vm33_vm0, %v3470_v0  ;;  %2360 = vmatmul.msk.f32.gmra.mxu3 %vm33_vm0, %v3470_v0 }
 0x247   :  { %1974 = vst [vmem:[%s4354_s8 + $0x1e8] sm:$0xff] %v1878_v14  ;;  %v3849_v11 = vpop.f32.mrf.mxu0 }
 0x249   :  { %v1367_v50 = vpop.f32.mrf.mxu2  ;;  %v1432_v1 = vpop.f32.mrf.mxu3 }
 0x24a   :  { %v1773_v42 = vadd.f32 %v1367_v50, %v924_v61  ;;  %v1774_v4 = vadd.f32 %v1432_v1, %v989_v48  ;;  %v3851_v47 = vpop.f32.mrf.mxu1  ;;  %2313 = vmatmul.msk.f32.gmra.mxu0 %vm33_vm0, %v3489_v41  ;;  %v4501_v48 = vld [vmem:[#allocation22_spill] sm:$0xff]  ;;  %v4502_v50 = vld [vmem:[#allocation112_spill] sm:$0xff]  ;;  %v4503_v1 = vld [vmem:[#allocation23_spill] sm:$0xff] }
 0x24c   :  { %v1883_v2 = vadd.f32 %v3578_v19, %v1773_v42  ;;  %v1884_v0 = vadd.f32 %v3583_v55, %v1774_v4  ;;  %v933_v42 = vadd.f32 %v4502_v50, %v4501_v48  ;;  %v4504_v4 = vld [vmem:[#allocation114_spill] sm:$0xff] }
 0x24d   :  { %2329 = vmatmul.msk.f32.gmra.mxu1 %vm33_vm0, %v3489_v41 }
 0x24e   :  { %1979 = vst [vmem:[%s4354_s8 + $0x210] sm:$0xff] %v1883_v2  ;;  %2345 = vmatmul.msk.f32.gmra.mxu2 %vm33_vm0, %v3489_v41  ;;  %2361 = vmatmul.msk.f32.gmra.mxu3 %vm33_vm0, %v3489_v41  ;;  %v998_v2 = vadd.f32 %v4504_v4, %v4503_v1 }
 0x24f   :  { %1980 = vst [vmem:[%s4354_s8 + $0x218] sm:$0xff] %v1884_v0  ;;  %v3873_v54 = vpop.f32.mrf.mxu0 }
 0x251   :  { %v1370_v34 = vpop.f32.mrf.mxu2  ;;  %v1435_v51 = vpop.f32.mrf.mxu3 }
 0x252   :  { %v1779_v35 = vadd.f32 %v1370_v34, %v927_v52  ;;  %v1780_v33 = vadd.f32 %v1435_v51, %v992_v9  ;;  %v3875_v16 = vpop.f32.mrf.mxu1  ;;  %2314 = vmatmul.msk.f32.gmra.mxu0 %vm33_vm0, %v4495_v15  ;;  %v4505_v34 = vld [vmem:[#allocation120_spill] sm:$0xff]  ;;  %v4506_v51 = vld [vmem:[#allocation25_spill] sm:$0xff] }
 0x254   :  { %v1889_v13 = vadd.f32 %v3578_v19, %v1779_v35  ;;  %v1890_v41 = vadd.f32 %v3583_v55, %v1780_v33  ;;  %v4507_v33 = vld [vmem:[#allocation117_spill] sm:$0xff] }
 0x255   :  { %2330 = vmatmul.msk.f32.gmra.mxu1 %vm33_vm0, %v4495_v15 }
 0x256   :  { %1985 = vst [vmem:[%s4354_s8 + $0x240] sm:$0xff] %v1889_v13  ;;  %2346 = vmatmul.msk.f32.gmra.mxu2 %vm33_vm0, %v4495_v15  ;;  %2362 = vmatmul.msk.f32.gmra.mxu3 %vm33_vm0, %v4495_v15  ;;  %v936_v13 = vadd.f32 %v4507_v33, %v4506_v51  ;;  %v3944_v15 = vperm.slane %v3567_v10, 2  ;;  %v4517_v33 = vld [vmem:[#allocation31_spill] sm:$0xff] }
 0x257   :  { %1986 = vst [vmem:[%s4354_s8 + $0x248] sm:$0xff] %v1890_v41  ;;  %v3897_v24 = vpop.f32.mrf.mxu0  ;;  %v4508_v41 = vld [vmem:[#allocation26_spill] sm:$0xff] }
 0x258   :  { %v1001_v53 = vadd.f32 %v4509_v26, %v4508_v41 }
 0x259   :  { %v1373_v60 = vpop.f32.mrf.mxu2  ;;  %v1438_v14 = vpop.f32.mrf.mxu3 }
 0x25a   :  { %v1785_v46 = vadd.f32 %v1373_v60, %v930_v31  ;;  %v1786_v27 = vadd.f32 %v1438_v14, %v995_v12  ;;  %v3899_v59 = vpop.f32.mrf.mxu1  ;;  %2315 = vmatmul.msk.f32.gmra.mxu0 %vm33_vm0, %v4500_v3  ;;  %v4511_v12 = vld [vmem:[#allocation77_spill] sm:$0xff] }
 0x25b   :  { %v1086_v60 = vadd.f32 %v4511_v12, %v4510_v56 }
 0x25c   :  { %v1895_v61 = vadd.f32 %v3578_v19, %v1785_v46  ;;  %v1896_v49 = vadd.f32 %v3583_v55, %v1786_v27  ;;  %v4512_v27 = vld [vmem:[#allocation76_spill] sm:$0xff] }
 0x25d   :  { %2331 = vmatmul.msk.f32.gmra.mxu1 %vm33_vm0, %v4500_v3 }
 0x25e   :  { %1991 = vst [vmem:[%s4354_s8 + $0x270] sm:$0xff] %v1895_v61  ;;  %2347 = vmatmul.msk.f32.gmra.mxu2 %vm33_vm0, %v4500_v3  ;;  %2363 = vmatmul.msk.f32.gmra.mxu3 %vm33_vm0, %v4500_v3  ;;  %v3952_v3 = vperm.slane %v3567_v10, 3 }
 0x25f   :  { %1992 = vst [vmem:[%s4354_s8 + $0x278] sm:$0xff] %v1896_v49  ;;  %v3921_v23 = vpop.f32.mrf.mxu0 }
 0x261   :  { %v1376_v0 = vpop.f32.mrf.mxu2  ;;  %v1441_v52 = vpop.f32.mrf.mxu3 }
 0x262   :  { %v1791_v44 = vadd.f32 %v1376_v0, %v933_v42  ;;  %v1792_v62 = vadd.f32 %v1441_v52, %v998_v2  ;;  %v3923_v8 = vpop.f32.mrf.mxu1  ;;  %2316 = vmatmul.msk.f32.gmra.mxu0 %vm33_vm0, %v4505_v34  ;;  %v4513_v0 = vld [vmem:[#allocation29_spill] sm:$0xff] }
 0x264   :  { %v1901_v9 = vadd.f32 %v3578_v19, %v1791_v44  ;;  %v1902_v35 = vadd.f32 %v3583_v55, %v1792_v62  ;;  %v4514_v44 = vld [vmem:[#allocation122_spill] sm:$0xff]  ;;  %v4516_v62 = vld [vmem:[#allocation124_spill] sm:$0xff] }
 0x265   :  { %2332 = vmatmul.msk.f32.gmra.mxu1 %vm33_vm0, %v4505_v34  ;;  %v1151_v52 = vadd.f32 %v4514_v44, %v4513_v0 }
 0x266   :  { %1997 = vst [vmem:[%s4354_s8 + $0x2a0] sm:$0xff] %v1901_v9  ;;  %2348 = vmatmul.msk.f32.gmra.mxu2 %vm33_vm0, %v4505_v34  ;;  %2364 = vmatmul.msk.f32.gmra.mxu3 %vm33_vm0, %v4505_v34 }
 0x267   :  { %1998 = vst [vmem:[%s4354_s8 + $0x2a8] sm:$0xff] %v1902_v35  ;;  %v1464_v36 = vpop.f32.mrf.mxu0  ;;  %v3978_v35 = vperm.slane %v3567_v10, 5 }
 0x268   :  { %v1709_v61 = vadd.f32 %v1464_v36, %v4512_v27 }
 0x269   :  { %v1379_v31 = vpop.f32.mrf.mxu2  ;;  %v1444_v14 = vpop.f32.mrf.mxu3 }
 0x26a   :  { %v1797_v46 = vadd.f32 %v1379_v31, %v936_v13  ;;  %v1798_v49 = vadd.f32 %v1444_v14, %v1001_v53  ;;  %v1529_v48 = vpop.f32.mrf.mxu1  ;;  %v1819_v42 = vadd.f32 %v3944_v15, %v1709_v61  ;;  %v4518_v13 = vld [vmem:[#allocation79_spill] sm:$0xff]  ;;  %v4519_v31 = vld [vmem:[#allocation78_spill] sm:$0xff]  ;;  %v4520_v61 = vld [vmem:[#allocation32_spill] sm:$0xff] }
 0x26b   :  { %v1710_v1 = vadd.f32 %v1529_v48, %v1086_v60  ;;  %v1089_v41 = vadd.f32 %v4518_v13, %v4517_v33  ;;  %v4521_v48 = vld [vmem:[#allocation33_spill] sm:$0xff] }
 0x26c   :  { %v1907_v50 = vadd.f32 %v3578_v19, %v1797_v46  ;;  %v1908_v4 = vadd.f32 %v3583_v55, %v1798_v49  ;;  %1915 = vst [vmem:[%s4354_s8 + $0x10] sm:$0xff] %v1819_v42  ;;  %v3970_v19 = vperm.slane %v3567_v10, 4  ;;  %v4515_v55 = vld [vmem:[#allocation30_spill] sm:$0xff]  ;;  %v1154_v49 = vadd.f32 %v3585_v38, %v4520_v61 }
 0x26d   :  { %v1820_v2 = vadd.f32 %v3952_v3, %v1710_v1  ;;  %v1216_v9 = vadd.f32 %v4516_v62, %v4515_v55  ;;  %v4524_v55 = vld [vmem:[#allocation80_spill] sm:$0xff] }
 0x26e   :  { %2003 = vst [vmem:[%s4354_s8 + $0x2d0] sm:$0xff] %v1907_v50  ;;  %v1219_v50 = vadd.f32 %v3587_v43, %v4521_v48 }
 0x26f   :  { %2004 = vst [vmem:[%s4354_s8 + $0x2d8] sm:$0xff] %v1908_v4  ;;  %v1467_v51 = vpop.f32.mrf.mxu0  ;;  %v4522_v4 = vld [vmem:[#allocation34_spill] sm:$0xff] }
 0x270   :  { %1916 = vst [vmem:[%s4354_s8 + $0x18] sm:$0xff] %v1820_v2  ;;  %v1715_v36 = vadd.f32 %v1467_v51, %v4519_v31  ;;  %v4523_v2 = vld [vmem:[#allocation81_spill] sm:$0xff]  ;;  %v4527_v31 = vld [vmem:[#allocation35_spill] sm:$0xff] }
 0x271   :  { %v1594_v34 = vpop.f32.mrf.mxu2  ;;  %v1659_v53 = vpop.f32.mrf.mxu3  ;;  %v1092_v0 = vadd.f32 %v4523_v2, %v4522_v4 }
 0x272   :  { %v1711_v26 = vadd.f32 %v1594_v34, %v1151_v52  ;;  %v1712_v56 = vadd.f32 %v1659_v53, %v1216_v9  ;;  %v1532_v12 = vpop.f32.mrf.mxu1  ;;  %v1825_v46 = vadd.f32 %v3944_v15, %v1715_v36  ;;  %v1157_v36 = vadd.f32 %v3609_v28, %v4527_v31 }
 0x273   :  { %v1716_v14 = vadd.f32 %v1532_v12, %v1089_v41  ;;  %v4525_v41 = vld [vmem:[#allocation3_spill] sm:$0xff] }
 0x274   :  { %v1821_v60 = vadd.f32 %v3970_v19, %v1711_v26  ;;  %v1822_v27 = vadd.f32 %v3978_v35, %v1712_v56  ;;  %1921 = vst [vmem:[%s4354_s8 + $0x40] sm:$0xff] %v1825_v46  ;;  %v4526_v26 = vld [vmem:[#allocation82_spill] sm:$0xff]  ;;  %v4528_v56 = vld [vmem:[#allocation36_spill] sm:$0xff] }
 0x275   :  { %v1826_v10 = vadd.f32 %v3952_v3, %v1716_v14  ;;  %v1030_v53 = vadd.f32 %v4526_v26, %v4525_v41  ;;  %v1222_v12 = vadd.f32 %v3611_v20, %v4528_v56  ;;  %v4529_v14 = vld [vmem:[#allocation37_spill] sm:$0xff] }
 0x276   :  { %1917 = vst [vmem:[%s4354_s8 + $0x20] sm:$0xff] %v1821_v60 }
 0x277   :  { %1918 = vst [vmem:[%s4354_s8 + $0x28] sm:$0xff] %v1822_v27  ;;  %v1470_v1 = vpop.f32.mrf.mxu0  ;;  %v4530_v27 = vld [vmem:[#allocation83_spill] sm:$0xff] }
 0x278   :  { %1922 = vst [vmem:[%s4354_s8 + $0x48] sm:$0xff] %v1826_v10  ;;  %v1721_v38 = vadd.f32 %v1470_v1, %v4524_v55  ;;  %v1095_v10 = vadd.f32 %v4530_v27, %v4529_v14  ;;  %v4533_v55 = vld [vmem:[#allocation38_spill] sm:$0xff] }
 0x279   :  { %v1597_v42 = vpop.f32.mrf.mxu2  ;;  %v1662_v52 = vpop.f32.mrf.mxu3  ;;  %v4538_v14 = vld [vmem:[#allocation86_spill] sm:$0xff] }
 0x27a   :  { %v1717_v44 = vadd.f32 %v1597_v42, %v1154_v49  ;;  %v1718_v62 = vadd.f32 %v1662_v52, %v1219_v50  ;;  %v1535_v9 = vpop.f32.mrf.mxu1  ;;  %v1831_v51 = vadd.f32 %v3944_v15, %v1721_v38  ;;  %v1160_v38 = vadd.f32 %v3633_v17, %v4533_v55 }
 0x27b   :  { %v1722_v43 = vadd.f32 %v1535_v9, %v1092_v0  ;;  %v4531_v0 = vld [vmem:[#allocation4_spill] sm:$0xff] }
 0x27c   :  { %v1827_v34 = vadd.f32 %v3970_v19, %v1717_v44  ;;  %v1828_v33 = vadd.f32 %v3978_v35, %v1718_v62  ;;  %1927 = vst [vmem:[%s4354_s8 + $0x70] sm:$0xff] %v1831_v51  ;;  %v4532_v44 = vld [vmem:[#allocation84_spill] sm:$0xff]  ;;  %v4534_v62 = vld [vmem:[#allocation39_spill] sm:$0xff] }
 0x27d   :  { %v1832_v13 = vadd.f32 %v3952_v3, %v1722_v43  ;;  %v1033_v52 = vadd.f32 %v4532_v44, %v4531_v0  ;;  %v1225_v9 = vadd.f32 %v3635_v6, %v4534_v62  ;;  %v4535_v43 = vld [vmem:[#allocation40_spill] sm:$0xff] }
 0x27e   :  { %1923 = vst [vmem:[%s4354_s8 + $0x50] sm:$0xff] %v1827_v34 }
 0x27f   :  { %1924 = vst [vmem:[%s4354_s8 + $0x58] sm:$0xff] %v1828_v33  ;;  %v1473_v46 = vpop.f32.mrf.mxu0  ;;  %v4536_v33 = vld [vmem:[#allocation85_spill] sm:$0xff] }
 0x280   :  { %1928 = vst [vmem:[%s4354_s8 + $0x78] sm:$0xff] %v1832_v13  ;;  %v1727_v48 = vadd.f32 %v1473_v46, %v1030_v53  ;;  %v1098_v13 = vadd.f32 %v4536_v33, %v4535_v43  ;;  %v4537_v46 = vld [vmem:[#allocation5_spill] sm:$0xff]  ;;  %v4545_v43 = vld [vmem:[#allocation44_spill] sm:$0xff] }
 0x281   :  { %v1600_v60 = vpop.f32.mrf.mxu2  ;;  %v1665_v49 = vpop.f32.mrf.mxu3  ;;  %v1036_v27 = vadd.f32 %v4538_v14, %v4537_v46  ;;  %v1166_v33 = vadd.f32 %v3681_v58, %v4545_v43  ;;  %v4556_v43 = vld [vmem:[#allocation92_spill] sm:$0xff] }
 0x282   :  { %v1723_v61 = vadd.f32 %v1600_v60, %v1157_v36  ;;  %v1724_v28 = vadd.f32 %v1665_v49, %v1222_v12  ;;  %v1538_v50 = vpop.f32.mrf.mxu1  ;;  %v1837_v1 = vadd.f32 %v3944_v15, %v1727_v48  ;;  %v4540_v49 = vld [vmem:[#allocation42_spill] sm:$0xff] }
 0x283   :  { %v1728_v4 = vadd.f32 %v1538_v50, %v1095_v10  ;;  %v4539_v10 = vld [vmem:[#allocation41_spill] sm:$0xff]  ;;  %v1228_v48 = vadd.f32 %v3659_v25, %v4540_v49  ;;  %v4550_v49 = vld [vmem:[#allocation90_spill] sm:$0xff] }
 0x284   :  { %v1833_v42 = vadd.f32 %v3970_v19, %v1723_v61  ;;  %v1834_v20 = vadd.f32 %v3978_v35, %v1724_v28  ;;  %1933 = vst [vmem:[%s4354_s8 + $0xa0] sm:$0xff] %v1837_v1  ;;  %v1163_v61 = vadd.f32 %v3657_v37, %v4539_v10  ;;  %v4542_v1 = vld [vmem:[#allocation87_spill] sm:$0xff] }
 0x285   :  { %v1838_v2 = vadd.f32 %v3952_v3, %v1728_v4 }
 0x286   :  { %1929 = vst [vmem:[%s4354_s8 + $0x80] sm:$0xff] %v1833_v42  ;;  %v4541_v42 = vld [vmem:[#allocation43_spill] sm:$0xff] }
 0x287   :  { %1930 = vst [vmem:[%s4354_s8 + $0x88] sm:$0xff] %v1834_v20  ;;  %v1476_v51 = vpop.f32.mrf.mxu0  ;;  %v1101_v4 = vadd.f32 %v4542_v1, %v4541_v42  ;;  %v4552_v42 = vld [vmem:[#allocation48_spill] sm:$0xff] }
 0x288   :  { %1934 = vst [vmem:[%s4354_s8 + $0xa8] sm:$0xff] %v1838_v2  ;;  %v1733_v53 = vadd.f32 %v1476_v51, %v1033_v52  ;;  %v1234_v1 = vadd.f32 %v3707_v63, %v4552_v42  ;;  %v4564_v42 = vld [vmem:[#allocation54_spill] sm:$0xff] }
 0x289   :  { %v1603_v34 = vpop.f32.mrf.mxu2  ;;  %v1668_v26 = vpop.f32.mrf.mxu3 }
 0x28a   :  { %v1729_v41 = vadd.f32 %v1603_v34, %v1160_v38  ;;  %v1730_v17 = vadd.f32 %v1668_v26, %v1225_v9  ;;  %v1541_v31 = vpop.f32.mrf.mxu1  ;;  %v1843_v56 = vadd.f32 %v3944_v15, %v1733_v53  ;;  %v4543_v9 = vld [vmem:[#allocation6_spill] sm:$0xff]  ;;  %v4544_v34 = vld [vmem:[#allocation88_spill] sm:$0xff] }
 0x28b   :  { %v1734_v12 = vadd.f32 %v1541_v31, %v1098_v13  ;;  %v1039_v51 = vadd.f32 %v4544_v34, %v4543_v9  ;;  %v4546_v13 = vld [vmem:[#allocation45_spill] sm:$0xff] }
 0x28c   :  { %v1839_v36 = vadd.f32 %v3970_v19, %v1729_v41  ;;  %v1840_v6 = vadd.f32 %v3978_v35, %v1730_v17  ;;  %1939 = vst [vmem:[%s4354_s8 + $0xd0] sm:$0xff] %v1843_v56  ;;  %v1231_v41 = vadd.f32 %v3683_v32, %v4546_v13  ;;  %v4547_v17 = vld [vmem:[#allocation46_spill] sm:$0xff]  ;;  %v4548_v31 = vld [vmem:[#allocation89_spill] sm:$0xff] }
 0x28d   :  { %v1844_v60 = vadd.f32 %v3952_v3, %v1734_v12  ;;  %v4557_v13 = vld [vmem:[#allocation50_spill] sm:$0xff] }
 0x28e   :  { %1935 = vst [vmem:[%s4354_s8 + $0xb0] sm:$0xff] %v1839_v36  ;;  %v1104_v36 = vadd.f32 %v4548_v31, %v4547_v17 }
 0x28f   :  { %1936 = vst [vmem:[%s4354_s8 + $0xb8] sm:$0xff] %v1840_v6  ;;  %v1479_v50 = vpop.f32.mrf.mxu0 }
 0x290   :  { %1940 = vst [vmem:[%s4354_s8 + $0xd8] sm:$0xff] %v1844_v60  ;;  %v1739_v0 = vadd.f32 %v1479_v50, %v1036_v27 }
 0x291   :  { %v1606_v28 = vpop.f32.mrf.mxu2  ;;  %v1671_v2 = vpop.f32.mrf.mxu3 }
 0x292   :  { %v1735_v20 = vadd.f32 %v1606_v28, %v1163_v61  ;;  %v1736_v37 = vadd.f32 %v1671_v2, %v1228_v48  ;;  %v1544_v44 = vpop.f32.mrf.mxu1  ;;  %v1849_v55 = vadd.f32 %v3944_v15, %v1739_v0  ;;  %v4549_v61 = vld [vmem:[#allocation7_spill] sm:$0xff]  ;;  %v4553_v2 = vld [vmem:[#allocation49_spill] sm:$0xff] }
 0x293   :  { %v1740_v38 = vadd.f32 %v1544_v44, %v1101_v4  ;;  %v1042_v48 = vadd.f32 %v4550_v49, %v4549_v61  ;;  %v4551_v28 = vld [vmem:[#allocation47_spill] sm:$0xff]  ;;  %v4561_v61 = vld [vmem:[#allocation9_spill] sm:$0xff]  ;;  %v4562_v49 = vld [vmem:[#allocation94_spill] sm:$0xff] }
 0x294   :  { %v1845_v52 = vadd.f32 %v3970_v19, %v1735_v20  ;;  %v1846_v25 = vadd.f32 %v3978_v35, %v1736_v37  ;;  %1945 = vst [vmem:[%s4354_s8 + $0x100] sm:$0xff] %v1849_v55  ;;  %v1169_v50 = vadd.f32 %v3705_v30, %v4551_v28  ;;  %v4554_v0 = vld [vmem:[#allocation91_spill] sm:$0xff]  ;;  %v4563_v28 = vld [vmem:[#allocation53_spill] sm:$0xff] }
 0x295   :  { %v1850_v62 = vadd.f32 %v3952_v3, %v1740_v38  ;;  %v1107_v37 = vadd.f32 %v4554_v0, %v4553_v2  ;;  %v4565_v2 = vld [vmem:[#allocation55_spill] sm:$0xff]  ;;  %v4566_v0 = vld [vmem:[#allocation96_spill] sm:$0xff] }
 0x296   :  { %1941 = vst [vmem:[%s4354_s8 + $0xe0] sm:$0xff] %v1845_v52 }
 0x297   :  { %1942 = vst [vmem:[%s4354_s8 + $0xe8] sm:$0xff] %v1846_v25  ;;  %v1482_v53 = vpop.f32.mrf.mxu0 }
 0x298   :  { %1946 = vst [vmem:[%s4354_s8 + $0x108] sm:$0xff] %v1850_v62  ;;  %v1745_v6 = vadd.f32 %v1482_v53, %v1039_v51  ;;  %v4555_v51 = vld [vmem:[#allocation8_spill] sm:$0xff] }
 0x299   :  { %v1609_v26 = vpop.f32.mrf.mxu2  ;;  %v1674_v12 = vpop.f32.mrf.mxu3 }
 0x29a   :  { %v1741_v56 = vadd.f32 %v1609_v26, %v1166_v33  ;;  %v1742_v58 = vadd.f32 %v1674_v12, %v1231_v41  ;;  %v1547_v60 = vpop.f32.mrf.mxu1  ;;  %v1855_v14 = vadd.f32 %v3944_v15, %v1745_v6  ;;  %v1045_v33 = vadd.f32 %v4556_v43, %v4555_v51  ;;  %v4558_v26 = vld [vmem:[#allocation51_spill] sm:$0xff]  ;;  %v4569_v43 = vld [vmem:[#allocation56_spill] sm:$0xff] }
 0x29b   :  { %v1746_v27 = vadd.f32 %v1547_v60, %v1104_v36  ;;  %v1172_v41 = vadd.f32 %v3729_v29, %v4557_v13  ;;  %v1237_v53 = vadd.f32 %v3731_v7, %v4558_v26  ;;  %v4559_v36 = vld [vmem:[#allocation52_spill] sm:$0xff]  ;;  %v4570_v13 = vld [vmem:[#allocation57_spill] sm:$0xff] }
 0x29c   :  { %v1851_v46 = vadd.f32 %v3970_v19, %v1741_v56  ;;  %v1852_v32 = vadd.f32 %v3978_v35, %v1742_v58  ;;  %1951 = vst [vmem:[%s4354_s8 + $0x130] sm:$0xff] %v1855_v14  ;;  %v4560_v56 = vld [vmem:[#allocation93_spill] sm:$0xff] }
 0x29d   :  { %v1856_v10 = vadd.f32 %v3952_v3, %v1746_v27  ;;  %v1110_v12 = vadd.f32 %v4560_v56, %v4559_v36 }
 0x29e   :  { %1947 = vst [vmem:[%s4354_s8 + $0x110] sm:$0xff] %v1851_v46 }
 0x29f   :  { %1948 = vst [vmem:[%s4354_s8 + $0x118] sm:$0xff] %v1852_v32  ;;  %v1485_v20 = vpop.f32.mrf.mxu0 }
 0x2a0   :  { %1952 = vst [vmem:[%s4354_s8 + $0x138] sm:$0xff] %v1856_v10  ;;  %v1751_v55 = vadd.f32 %v1485_v20, %v1042_v48  ;;  %v1048_v48 = vadd.f32 %v4562_v49, %v4561_v61  ;;  %v4576_v49 = vld [vmem:[#allocation60_spill] sm:$0xff] }
 0x2a1   :  { %v1612_v4 = vpop.f32.mrf.mxu2  ;;  %v1677_v52 = vpop.f32.mrf.mxu3 }
 0x2a2   :  { %v1747_v44 = vadd.f32 %v1612_v4, %v1169_v50  ;;  %v1748_v30 = vadd.f32 %v1677_v52, %v1234_v1  ;;  %v1550_v38 = vpop.f32.mrf.mxu1  ;;  %v1861_v62 = vadd.f32 %v3944_v15, %v1751_v55  ;;  %v1175_v50 = vadd.f32 %v3753_v21, %v4563_v28 }
 0x2a3   :  { %v1752_v9 = vadd.f32 %v1550_v38, %v1107_v37  ;;  %v1240_v1 = vadd.f32 %v3755_v40, %v4564_v42  ;;  %v1113_v37 = vadd.f32 %v4566_v0, %v4565_v2  ;;  %v4577_v42 = vld [vmem:[#allocation61_spill] sm:$0xff] }
 0x2a4   :  { %v1857_v25 = vadd.f32 %v3970_v19, %v1747_v44  ;;  %v1858_v63 = vadd.f32 %v3978_v35, %v1748_v30  ;;  %1957 = vst [vmem:[%s4354_s8 + $0x160] sm:$0xff] %v1861_v62 }
 0x2a5   :  { %v1862_v34 = vadd.f32 %v3952_v3, %v1752_v9 }
 0x2a6   :  { %1953 = vst [vmem:[%s4354_s8 + $0x140] sm:$0xff] %v1857_v25 }
 0x2a7   :  { %1954 = vst [vmem:[%s4354_s8 + $0x148] sm:$0xff] %v1858_v63  ;;  %v1488_v31 = vpop.f32.mrf.mxu0  ;;  %v4567_v63 = vld [vmem:[#allocation12_spill] sm:$0xff] }
 0x2a8   :  { %1958 = vst [vmem:[%s4354_s8 + $0x168] sm:$0xff] %v1862_v34  ;;  %v1757_v60 = vadd.f32 %v1488_v31, %v1045_v33  ;;  %v4568_v34 = vld [vmem:[#allocation98_spill] sm:$0xff]  ;;  %v1178_v33 = vadd.f32 %v3777_v45, %v4569_v43  ;;  %v4572_v31 = vld [vmem:[#allocation100_spill] sm:$0xff] }
 0x2a9   :  { %v1615_v17 = vpop.f32.mrf.mxu2  ;;  %v1680_v58 = vpop.f32.mrf.mxu3  ;;  %v1051_v51 = vadd.f32 %v4568_v34, %v4567_v63  ;;  %v4583_v43 = vld [vmem:[#allocation64_spill] sm:$0xff] }
 0x2aa   :  { %v1753_v6 = vadd.f32 %v1615_v17, %v1172_v41  ;;  %v1754_v29 = vadd.f32 %v1680_v58, %v1237_v53  ;;  %v1553_v46 = vpop.f32.mrf.mxu1  ;;  %v1867_v27 = vadd.f32 %v3944_v15, %v1757_v60  ;;  %v1243_v41 = vadd.f32 %v3779_v39, %v4570_v13  ;;  %v4571_v17 = vld [vmem:[#allocation58_spill] sm:$0xff] }
 0x2ab   :  { %v1758_v32 = vadd.f32 %v1553_v46, %v1110_v12  ;;  %v1116_v36 = vadd.f32 %v4572_v31, %v4571_v17 }
 0x2ac   :  { %v1863_v14 = vadd.f32 %v3970_v19, %v1753_v6  ;;  %v1864_v7 = vadd.f32 %v3978_v35, %v1754_v29  ;;  %1963 = vst [vmem:[%s4354_s8 + $0x190] sm:$0xff] %v1867_v27  ;;  %v4573_v27 = vld [vmem:[#allocation15_spill] sm:$0xff] }
 0x2ad   :  { %v1868_v10 = vadd.f32 %v3952_v3, %v1758_v32  ;;  %v4574_v32 = vld [vmem:[#allocation102_spill] sm:$0xff] }
 0x2ae   :  { %1959 = vst [vmem:[%s4354_s8 + $0x170] sm:$0xff] %v1863_v14 }
 0x2af   :  { %1960 = vst [vmem:[%s4354_s8 + $0x178] sm:$0xff] %v1864_v7  ;;  %v1491_v20 = vpop.f32.mrf.mxu0  ;;  %v1054_v7 = vadd.f32 %v4574_v32, %v4573_v27  ;;  %v4589_v32 = vld [vmem:[#allocation67_spill] sm:$0xff] }
 0x2b0   :  { %1964 = vst [vmem:[%s4354_s8 + $0x198] sm:$0xff] %v1868_v10  ;;  %v1763_v55 = vadd.f32 %v1491_v20, %v1048_v48  ;;  %v4575_v10 = vld [vmem:[#allocation59_spill] sm:$0xff]  ;;  %v1246_v48 = vadd.f32 %v3803_v22, %v4576_v49 }
 0x2b1   :  { %v1618_v4 = vpop.f32.mrf.mxu2  ;;  %v1683_v52 = vpop.f32.mrf.mxu3  ;;  %v1181_v61 = vadd.f32 %v3801_v5, %v4575_v10 }
 0x2b2   :  { %v1759_v44 = vadd.f32 %v1618_v4, %v1175_v50  ;;  %v1760_v21 = vadd.f32 %v1683_v52, %v1240_v1  ;;  %v1556_v30 = vpop.f32.mrf.mxu1  ;;  %v1873_v25 = vadd.f32 %v3944_v15, %v1763_v55  ;;  %v4578_v1 = vld [vmem:[#allocation104_spill] sm:$0xff] }
 0x2b3   :  { %v1764_v62 = vadd.f32 %v1556_v30, %v1113_v37  ;;  %v1119_v4 = vadd.f32 %v4578_v1, %v4577_v42  ;;  %v4579_v30 = vld [vmem:[#allocation18_spill] sm:$0xff] }
 0x2b4   :  { %v1869_v38 = vadd.f32 %v3970_v19, %v1759_v44  ;;  %v1870_v40 = vadd.f32 %v3978_v35, %v1760_v21  ;;  %1969 = vst [vmem:[%s4354_s8 + $0x1c0] sm:$0xff] %v1873_v25 }
 0x2b5   :  { %v1874_v9 = vadd.f32 %v3952_v3, %v1764_v62  ;;  %v4581_v62 = vld [vmem:[#allocation62_spill] sm:$0xff] }
 0x2b6   :  { %1965 = vst [vmem:[%s4354_s8 + $0x1a0] sm:$0xff] %v1869_v38  ;;  %v4580_v38 = vld [vmem:[#allocation106_spill] sm:$0xff] }
 0x2b7   :  { %1966 = vst [vmem:[%s4354_s8 + $0x1a8] sm:$0xff] %v1870_v40  ;;  %v1494_v53 = vpop.f32.mrf.mxu0  ;;  %v1057_v25 = vadd.f32 %v4580_v38, %v4579_v30  ;;  %v1184_v40 = vadd.f32 %v3825_v57, %v4581_v62  ;;  %v4596_v30 = vld [vmem:[#allocation118_spill] sm:$0xff] }
 0x2b8   :  { %1970 = vst [vmem:[%s4354_s8 + $0x1c8] sm:$0xff] %v1874_v9  ;;  %v1769_v6 = vadd.f32 %v1494_v53, %v1051_v51  ;;  %v4582_v9 = vld [vmem:[#allocation63_spill] sm:$0xff] }
 0x2b9   :  { %v1621_v26 = vpop.f32.mrf.mxu2  ;;  %v1686_v12 = vpop.f32.mrf.mxu3  ;;  %v1249_v63 = vadd.f32 %v3827_v18, %v4582_v9 }
 0x2ba   :  { %v1765_v56 = vadd.f32 %v1621_v26, %v1178_v33  ;;  %v1766_v45 = vadd.f32 %v1686_v12, %v1243_v41  ;;  %v1559_v58 = vpop.f32.mrf.mxu1  ;;  %v1879_v29 = vadd.f32 %v3944_v15, %v1769_v6  ;;  %v4584_v33 = vld [vmem:[#allocation108_spill] sm:$0xff]  ;;  %v4585_v6 = vld [vmem:[#allocation21_spill] sm:$0xff] }
 0x2bb   :  { %v1770_v46 = vadd.f32 %v1559_v58, %v1116_v36  ;;  %v1122_v13 = vadd.f32 %v4584_v33, %v4583_v43  ;;  %v4597_v33 = vld [vmem:[#allocation27_spill] sm:$0xff] }
 0x2bc   :  { %v1875_v60 = vadd.f32 %v3970_v19, %v1765_v56  ;;  %v1876_v39 = vadd.f32 %v3978_v35, %v1766_v45  ;;  %1975 = vst [vmem:[%s4354_s8 + $0x1f0] sm:$0xff] %v1879_v29  ;;  %v4586_v45 = vld [vmem:[#allocation111_spill] sm:$0xff] }
 0x2bd   :  { %v1880_v14 = vadd.f32 %v3952_v3, %v1770_v46  ;;  %v1060_v58 = vadd.f32 %v4586_v45, %v4585_v6  ;;  %v4588_v46 = vld [vmem:[#allocation66_spill] sm:$0xff] }
 0x2be   :  { %1971 = vst [vmem:[%s4354_s8 + $0x1d0] sm:$0xff] %v1875_v60  ;;  %v4587_v60 = vld [vmem:[#allocation65_spill] sm:$0xff] }
 0x2bf   :  { %1972 = vst [vmem:[%s4354_s8 + $0x1d8] sm:$0xff] %v1876_v39  ;;  %v1497_v50 = vpop.f32.mrf.mxu0  ;;  %v1187_v29 = vadd.f32 %v3849_v11, %v4587_v60  ;;  %v1252_v39 = vadd.f32 %v3851_v47, %v4588_v46 }
 0x2c0   :  { %1976 = vst [vmem:[%s4354_s8 + $0x1f8] sm:$0xff] %v1880_v14  ;;  %v1775_v0 = vadd.f32 %v1497_v50, %v1054_v7  ;;  %v4590_v7 = vld [vmem:[#allocation113_spill] sm:$0xff] }
 0x2c1   :  { %v1624_v28 = vpop.f32.mrf.mxu2  ;;  %v1689_v2 = vpop.f32.mrf.mxu3  ;;  %v1125_v10 = vadd.f32 %v4590_v7, %v4589_v32 }
 0x2c2   :  { %v1771_v20 = vadd.f32 %v1624_v28, %v1181_v61  ;;  %v1772_v5 = vadd.f32 %v1689_v2, %v1246_v48  ;;  %v1562_v37 = vpop.f32.mrf.mxu1  ;;  %v1885_v52 = vadd.f32 %v3944_v15, %v1775_v0  ;;  %v4592_v2 = vld [vmem:[#allocation116_spill] sm:$0xff] }
 0x2c3   :  { %v1776_v55 = vadd.f32 %v1562_v37, %v1119_v4 }
 0x2c4   :  { %v1881_v44 = vadd.f32 %v3970_v19, %v1771_v20  ;;  %v1882_v22 = vadd.f32 %v3978_v35, %v1772_v5  ;;  %1981 = vst [vmem:[%s4354_s8 + $0x220] sm:$0xff] %v1885_v52  ;;  %v4591_v20 = vld [vmem:[#allocation24_spill] sm:$0xff] }
 0x2c5   :  { %v1886_v21 = vadd.f32 %v3952_v3, %v1776_v55  ;;  %v1063_v0 = vadd.f32 %v4592_v2, %v4591_v20  ;;  %v4593_v5 = vld [vmem:[#allocation68_spill] sm:$0xff] }
 0x2c6   :  { %1977 = vst [vmem:[%s4354_s8 + $0x200] sm:$0xff] %v1881_v44  ;;  %v1190_v37 = vadd.f32 %v3873_v54, %v4593_v5  ;;  %v4594_v44 = vld [vmem:[#allocation69_spill] sm:$0xff] }
 0x2c7   :  { %1978 = vst [vmem:[%s4354_s8 + $0x208] sm:$0xff] %v1882_v22  ;;  %v1500_v51 = vpop.f32.mrf.mxu0  ;;  %v1255_v52 = vadd.f32 %v3875_v16, %v4594_v44 }
 0x2c8   :  { %1982 = vst [vmem:[%s4354_s8 + $0x228] sm:$0xff] %v1886_v21  ;;  %v1781_v53 = vadd.f32 %v1500_v51, %v1057_v25  ;;  %v4595_v21 = vld [vmem:[#allocation70_spill] sm:$0xff] }
 0x2c9   :  { %v1627_v34 = vpop.f32.mrf.mxu2  ;;  %v1692_v26 = vpop.f32.mrf.mxu3  ;;  %v1128_v38 = vadd.f32 %v4596_v30, %v4595_v21 }
 0x2ca   :  { %v1777_v41 = vadd.f32 %v1627_v34, %v1184_v40  ;;  %v1778_v57 = vadd.f32 %v1692_v26, %v1249_v63  ;;  %v1565_v17 = vpop.f32.mrf.mxu1  ;;  %v1891_v36 = vadd.f32 %v3944_v15, %v1781_v53  ;;  %v4599_v26 = vld [vmem:[#allocation71_spill] sm:$0xff] }
 0x2cb   :  { %v1782_v56 = vadd.f32 %v1565_v17, %v1122_v13  ;;  %v4598_v13 = vld [vmem:[#allocation121_spill] sm:$0xff]  ;;  %v1193_v53 = vadd.f32 %v3897_v24, %v4599_v26 }
 0x2cc   :  { %v1887_v31 = vadd.f32 %v3970_v19, %v1777_v41  ;;  %v1888_v18 = vadd.f32 %v3978_v35, %v1778_v57  ;;  %1987 = vst [vmem:[%s4354_s8 + $0x250] sm:$0xff] %v1891_v36  ;;  %v1066_v41 = vadd.f32 %v4598_v13, %v4597_v33  ;;  %v4600_v57 = vld [vmem:[#allocation72_spill] sm:$0xff] }
 0x2cd   :  { %v1892_v12 = vadd.f32 %v3952_v3, %v1782_v56  ;;  %v1258_v17 = vadd.f32 %v3899_v59, %v4600_v57  ;;  %v4601_v56 = vld [vmem:[#allocation73_spill] sm:$0xff] }
 0x2ce   :  { %1983 = vst [vmem:[%s4354_s8 + $0x230] sm:$0xff] %v1887_v31 }
 0x2cf   :  { %1984 = vst [vmem:[%s4354_s8 + $0x238] sm:$0xff] %v1888_v18  ;;  %v1503_v27 = vpop.f32.mrf.mxu0  ;;  %v4602_v18 = vld [vmem:[#allocation123_spill] sm:$0xff] }
 0x2d0   :  { %1988 = vst [vmem:[%s4354_s8 + $0x258] sm:$0xff] %v1892_v12  ;;  %v1787_v48 = vadd.f32 %v1503_v27, %v1060_v58  ;;  %v1131_v12 = vadd.f32 %v4602_v18, %v4601_v56  ;;  %v4603_v27 = vld [vmem:[#allocation74_spill] sm:$0xff] }
 0x2d1   :  { %v1630_v14 = vpop.f32.mrf.mxu2  ;;  %v1695_v49 = vpop.f32.mrf.mxu3  ;;  %v1196_v32 = vadd.f32 %v3921_v23, %v4603_v27 }
 0x2d2   :  { %v1783_v61 = vadd.f32 %v1630_v14, %v1187_v29  ;;  %v1784_v11 = vadd.f32 %v1695_v49, %v1252_v39  ;;  %v1568_v28 = vpop.f32.mrf.mxu1  ;;  %v1897_v42 = vadd.f32 %v3944_v15, %v1787_v48 }
 0x2d3   :  { %v1788_v1 = vadd.f32 %v1568_v28, %v1125_v10 }
 0x2d4   :  { %v1893_v50 = vadd.f32 %v3970_v19, %v1783_v61  ;;  %v1894_v47 = vadd.f32 %v3978_v35, %v1784_v11  ;;  %1993 = vst [vmem:[%s4354_s8 + $0x280] sm:$0xff] %v1897_v42 }
 0x2d5   :  { %v1898_v4 = vadd.f32 %v3952_v3, %v1788_v1 }
 0x2d6   :  { %1989 = vst [vmem:[%s4354_s8 + $0x260] sm:$0xff] %v1893_v50 }
 0x2d7   :  { %1990 = vst [vmem:[%s4354_s8 + $0x268] sm:$0xff] %v1894_v47  ;;  %v1506_v22 = vpop.f32.mrf.mxu0 }
 0x2d8   :  { %1994 = vst [vmem:[%s4354_s8 + $0x288] sm:$0xff] %v1898_v4  ;;  %v1793_v40 = vadd.f32 %v1506_v22, %v1063_v0 }
 0x2d9   :  { %v1633_v55 = vpop.f32.mrf.mxu2  ;;  %v1698_v62 = vpop.f32.mrf.mxu3 }
 0x2da   :  { %v1789_v25 = vadd.f32 %v1633_v55, %v1190_v37  ;;  %v1790_v54 = vadd.f32 %v1698_v62, %v1255_v52  ;;  %v1571_v9 = vpop.f32.mrf.mxu1  ;;  %v1903_v34 = vadd.f32 %v3944_v15, %v1793_v40 }
 0x2db   :  { %v1794_v51 = vadd.f32 %v1571_v9, %v1128_v38 }
 0x2dc   :  { %v1899_v63 = vadd.f32 %v3970_v19, %v1789_v25  ;;  %v1900_v16 = vadd.f32 %v3978_v35, %v1790_v54  ;;  %1999 = vst [vmem:[%s4354_s8 + $0x2b0] sm:$0xff] %v1903_v34 }
 0x2dd   :  { %v1904_v43 = vadd.f32 %v3952_v3, %v1794_v51 }
 0x2de   :  { %1995 = vst [vmem:[%s4354_s8 + $0x290] sm:$0xff] %v1899_v63 }
 0x2df   :  { %1996 = vst [vmem:[%s4354_s8 + $0x298] sm:$0xff] %v1900_v16  ;;  %v1509_v36 = vpop.f32.mrf.mxu0 }
 0x2e0   :  { %2000 = vst [vmem:[%s4354_s8 + $0x2b8] sm:$0xff] %v1904_v43  ;;  %v1799_v58 = vadd.f32 %v1509_v36, %v1066_v41 }
 0x2e1   :  { %v1636_v31 = vpop.f32.mrf.mxu2  ;;  %v1701_v45 = vpop.f32.mrf.mxu3 }
 0x2e2   :  { %v1795_v6 = vadd.f32 %v1636_v31, %v1193_v53  ;;  %v1796_v24 = vadd.f32 %v1701_v45, %v1258_v17  ;;  %v1574_v60 = vpop.f32.mrf.mxu1  ;;  %v1909_v46 = vadd.f32 %v3944_v15, %v1799_v58  ;;  %v4604_v15 = vld [vmem:[#allocation75_spill] sm:$0xff] }
 0x2e3   :  { %v1800_v39 = vadd.f32 %v1574_v60, %v1131_v12  ;;  %v1261_v7 = vadd.f32 %v3923_v8, %v4604_v15 }
 0x2e4   :  { %v1905_v29 = vadd.f32 %v3970_v19, %v1795_v6  ;;  %v1906_v59 = vadd.f32 %v3978_v35, %v1796_v24  ;;  %2005 = vst [vmem:[%s4354_s8 + $0x2e0] sm:$0xff] %v1909_v46 }
 0x2e5   :  { %v1910_v14 = vadd.f32 %v3952_v3, %v1800_v39 }
 0x2e6   :  { %2001 = vst [vmem:[%s4354_s8 + $0x2c0] sm:$0xff] %v1905_v29 }
 0x2e7   :  { %2002 = vst [vmem:[%s4354_s8 + $0x2c8] sm:$0xff] %v1906_v59 }
 0x2e8   :  { %2006 = vst [vmem:[%s4354_s8 + $0x2e8] sm:$0xff] %v1910_v14 }
 0x2e9   :  { %v1639_v10 = vpop.f32.mrf.mxu2  ;;  %v1704_v61 = vpop.f32.mrf.mxu3 }
 0x2ea   :  { %v1801_v3 = vadd.f32 %v1639_v10, %v1196_v32  ;;  %v1802_v49 = vadd.f32 %v1704_v61, %v1261_v7 }
 0x2ec   :  { %v1911_v48 = vadd.f32 %v3970_v19, %v1801_v3  ;;  %v1912_v11 = vadd.f32 %v3978_v35, %v1802_v49 }
 0x2ee   :  { %2007 = vst [vmem:[%s4354_s8 + $0x2f0] sm:$0xff] %v1911_v48 }
 0x2ef   :  { %2008 = vst [vmem:[%s4354_s8 + $0x2f8] sm:$0xff] %v1912_v11 }

</bundles_post_ra>
